<compile_context>
chip_gen: v7x
topology: tpu7x:2x2x1
jax: 0.10.0
libtpu: 0.0.40
codegen_flags: <defaults>
</compile_context>

<pallas_src>
import functools

import jax
import jax.numpy as jnp
from jax.experimental import pallas as pl
from jax.experimental.pallas import tpu as pltpu


# ----------------------------- fused Pallas kernel ---------------------------

def _fused_idp_kernel(patches_ref, pre_ref,
                      wc_ref, bc_ref, wfc_ref, bfc_ref,
                      w1x_ref, w1n_ref, w1a_ref, b1_ref,
                      w2_ref, b2_ref, w3_ref, b3_ref,
                      out_ref,
                      *, n_spatial, n_filters, half_rows, group):
    f32 = jnp.float32
    F = n_filters
    RP = 2 * half_rows                      # padded stacked rows per spatial pos
    out_dim = wfc_ref.shape[1]

    wc = wc_ref[...]                        # [CKK, F]  f32
    bc = bc_ref[...]                        # [1, F]    f32

    # --- encoder: conv (im2col GEMM) + ReLU + flatten + FC, fused as an
    #     accumulation over spatial slabs.  Every slice below starts on an
    #     8-sublane boundary (RP and F are multiples of 8), so this is pure
    #     vld/MXU work: no scratch stores, no XLU shuffles.
    feat = jnp.zeros((RP, out_dim), f32)
    for g0 in range(0, n_spatial, group):
        gs = min(group, n_spatial - g0)
        blk = patches_ref[g0 * RP:(g0 + gs) * RP, :]          # [gs*RP, CKK] f32
        conv = jnp.dot(blk, wc, preferred_element_type=f32)
        conv = jnp.maximum(conv + bc, 0.0)                    # [gs*RP, F] f32
        for j in range(gs):
            s = g0 + j
            feat = feat + jnp.dot(conv[j * RP:(j + 1) * RP, :],
                                  wfc_ref[s * F:(s + 1) * F, :],
                                  preferred_element_type=f32)
    feat = jnp.maximum(feat + bfc_ref[...], 0.0)              # [RP, out_dim] f32

    # --- split enc(x) / enc(next_x): each half is a full 8-row tile -> free slice
    fx = feat[0:half_rows, :].astype(jnp.bfloat16)
    fnx = feat[half_rows:RP, :].astype(jnp.bfloat16)

    # --- MLP layer 1: cat(fx, fnx, pre_actions) folded into 3 matmuls ---------
    h = (jnp.dot(fx, w1x_ref[...], preferred_element_type=f32)
         + jnp.dot(fnx, w1n_ref[...], preferred_element_type=f32)
         + jnp.dot(pre_ref[...], w1a_ref[...], preferred_element_type=f32)
         + b1_ref[...])
    h = jnp.maximum(h, 0.0).astype(jnp.bfloat16)

    # --- MLP layer 2 -----------------------------------------------------------
    h = jnp.dot(h, w2_ref[...], preferred_element_type=f32) + b2_ref[...]
    h = jnp.maximum(h, 0.0).astype(jnp.bfloat16)

    # --- MLP layer 3 (128-lane padded -> single unmasked [8,128] store) -------
    y = jnp.dot(h, w3_ref[...], preferred_element_type=f32) + b3_ref[...]
    out_ref[...] = y.astype(out_ref.dtype)


# ------------------------------- JAX wrapper ---------------------------------

def _im2col_padded(xs, k, stride, half_rows):
    """xs: [2, B, C, H, W] (x / next_x stacked) -> patches [Ho*Wo*2*half_rows, C*k*k].

    Row index = ((ho*Wo + wo)*2 + half)*half_rows + b   (spatial-major; each of
    the x / next_x halves is padded to a full 8-row sublane tile so every slab
    and the fx/fnx split are vreg-aligned inside the kernel).
    Col index = c*k*k + kh*k + kw                        (PyTorch Conv2d order)
    """
    two, B, C, H, W = xs.shape
    Ho = (H - k) // stride + 1
    Wo = (W - k) // stride + 1
    pieces = []
    for di in range(k):
        for dj in range(k):
            pieces.append(xs[:, :, :, di:di + stride * Ho:stride,
                             dj:dj + stride * Wo:stride])   # [2, B, C, Ho, Wo]
    p = jnp.stack(pieces, axis=3)                            # [2, B, C, k*k, Ho, Wo]
    p = p.transpose(4, 5, 0, 1, 2, 3)                        # [Ho, Wo, 2, B, C, k*k]
    p = p.reshape(Ho * Wo, 2, B, C * k * k)
    p = jnp.pad(p, ((0, 0), (0, 0), (0, half_rows - B), (0, 0)))
    return p.reshape(Ho * Wo * 2 * half_rows, C * k * k), Ho, Wo


def inverse_dynamic_predictor_forward(x, next_x, pre_actions, enc_params,
                                      mlp_params, *, action_dim,
                                      conv_kernel=3, conv_stride=2):
    """forward(): x=enc(x); nx=enc(next_x); y=mlp(cat(x, nx, pre_actions))."""
    wc, bc, wfc, bfc = enc_params
    w1x, w1n, w1a, b1, w2, b2, w3p, b3p = mlp_params
    B = x.shape[0]
    F = wc.shape[1]
    HALF = max(8, ((B + 7) // 8) * 8)       # pad each batch half to f32 sublane tile

    # TODO(synk): the strided im2col window extraction stays in XLA (tiny gather
    # on the 32 KiB stacked input); at production batch it should move in-kernel
    # (9 static shifted slices of a per-tile [tile, C, H, W] VMEM block) to avoid
    # the k*k-replicated HBM copy this transpose materializes.
    xs = jnp.stack([x, next_x], axis=0)                      # [2, B, C, H, W]
    patches, Ho, Wo = _im2col_padded(xs, conv_kernel, conv_stride, HALF)
    S = Ho * Wo

    # layout / padding assumptions relied on by the kernel
    assert HALF % 8 == 0 and B <= HALF
    assert F % 8 == 0, "filter count must be a sublane multiple"
    assert wfc.shape[0] == S * F, "encoder FC width must match flattened conv"
    assert action_dim <= w3p.shape[1], "action_dim exceeds padded output lanes"

    pre_pad = jnp.zeros((HALF, pre_actions.shape[1]), jnp.float32)
    pre_pad = pre_pad.at[:B].set(pre_actions.astype(jnp.float32)).astype(jnp.bfloat16)

    kernel = functools.partial(_fused_idp_kernel, n_spatial=S, n_filters=F,
                               half_rows=HALF, group=8)
    vmem = pl.BlockSpec(memory_space=pltpu.MemorySpace.VMEM)

    # Everything (inputs + weights + intermediates) is well under 1 MiB, so all
    # operands are whole-array VMEM refs and there is no grid.
    # NOTE(production batch): prepend a batch-tile axis to the patch row layout
    # (rows = (b_tile, s, half, b_in_tile)), add a row grid with
    # dimension_semantics=("parallel",) so both v7x TensorCores are used, give
    # every weight/bias a constant index_map (lambda i: (0, 0)) so the <250 KiB
    # of weights stay VMEM-resident across steps, and size the M tile against
    # v7x's 64 MiB VMEM / 32 MiB scoped default (set vmem_limit_bytes explicitly).
    y_pad = pl.pallas_call(
        kernel,
        out_shape=jax.ShapeDtypeStruct((HALF, w3p.shape[1]), jnp.float32),
        in_specs=[vmem] * 14,
        out_specs=vmem,
    )(patches, pre_pad, wc, bc, wfc, bfc, w1x, w1n, w1a, b1, w2, b2, w3p, b3p)

    return y_pad[:B, :action_dim]


# --------------------------- parameter construction --------------------------

def make_params(key, *, in_channels, num_filters, conv_kernel, conv_out_hw,
                out_dim, action_dim, accumulate_steps, hidden_dim, lane_pad=128):
    assert action_dim <= lane_pad
    ks = jax.random.split(key, 10)

    def lin(kw, kb, fan_in, fan_out):
        w = jax.random.normal(kw, (fan_in, fan_out), jnp.float32) / jnp.sqrt(fan_in)
        b = jax.random.normal(kb, (1, fan_out), jnp.float32) * 0.01
        return w, b

    # encoder conv: im2col weight [C*k*k, F], rows ordered (c, kh, kw).
    ckk = in_channels * conv_kernel * conv_kernel
    w_conv, b_conv = lin(ks[0], ks[1], ckk, num_filters)
    # encoder fc: rows ordered (ho, wo, f) — the NHWC flatten order the fused
    # kernel accumulates over.  (To load a torch checkpoint, permute rows from
    # torch's NCHW order: ours[s*F+f, o] = torch_w[o, f*S+s].)
    S = conv_out_hw * conv_out_hw
    w_fc, b_fc = lin(ks[2], ks[3], S * num_filters, out_dim)

    # mlp: Linear(out_dim*2 + (acc-1)*action_dim, hidden) -> ReLU
    #      -> Linear(hidden, hidden) -> ReLU -> Linear(hidden, action_dim)
    act_in = (accumulate_steps - 1) * action_dim
    w1, b1 = lin(ks[4], ks[5], out_dim * 2 + act_in, hidden_dim)
    w2, b2 = lin(ks[6], ks[7], hidden_dim, hidden_dim)
    w3, b3 = lin(ks[8], ks[9], hidden_dim, action_dim)

    # split layer-1 weight so cat(enc(x), enc(next_x), pre_actions) becomes
    # three matmuls inside the kernel (no in-kernel concatenate).
    w1x = w1[:out_dim]
    w1n = w1[out_dim:2 * out_dim]
    w1a = w1[2 * out_dim:]

    # pad the final layer to a 128-lane slab (lane-dense, unmasked output store).
    w3p = jnp.zeros((hidden_dim, lane_pad), jnp.float32).at[:, :action_dim].set(w3)
    b3p = jnp.zeros((1, lane_pad), jnp.float32).at[:, :action_dim].set(b3)

    bf = lambda a: a.astype(jnp.bfloat16)
    # conv / encoder-FC path stays f32 (tight numerics on the long-K path);
    # the small MLP uses bf16 MXU operands with f32 accumulation.
    enc_params = (w_conv, b_conv, w_fc, b_fc)
    mlp_params = (bf(w1x), bf(w1n), bf(w1a), b1, bf(w2), b2, bf(w3p), b3p)
    return enc_params, mlp_params


# ------------------------------ pure-JAX reference ---------------------------

def reference_forward(x, next_x, pre_actions, enc_params, mlp_params,
                      action_dim, conv_kernel=3, conv_stride=2):
    f32 = lambda a: a.astype(jnp.float32)
    wc, bc, wfc, bfc = (f32(p) for p in enc_params)
    w1x, w1n, w1a, b1, w2, b2, w3p, b3p = (f32(p) for p in mlp_params)
    C = x.shape[1]
    F = wc.shape[1]
    k = conv_kernel
    w4 = wc.T.reshape(F, C, k, k)   # [F, C, kh, kw] — torch Conv2d layout

    def enc(inp):
        conv = jax.lax.conv_general_dilated(
            inp, w4, window_strides=(conv_stride, conv_stride), padding="VALID",
            dimension_numbers=("NCHW", "OIHW", "NCHW"))
        conv = jnp.maximum(conv + bc.reshape(1, F, 1, 1), 0.0)
        flat = conv.transpose(0, 2, 3, 1).reshape(inp.shape[0], -1)  # (ho,wo,f)
        return jnp.maximum(flat @ wfc + bfc, 0.0)

    fx, fnx = enc(x), enc(next_x)
    w1 = jnp.concatenate([w1x, w1n, w1a], axis=0)
    cat = jnp.concatenate([fx, fnx, pre_actions], axis=1)
    h = jnp.maximum(cat @ w1 + b1, 0.0)
    h = jnp.maximum(h @ w2 + b2, 0.0)
    y = h @ w3p + b3p
    return y[:, :action_dim]


# ------------------------------------ main ------------------------------------

if __name__ == "__main__":
    B, C, H, W = 2, 4, 16, 16
    num_filters = 32
    out_dim = 32              # encoder.out_dim
    hidden_dim = 32
    action_dim = 4            # action_shape[0]
    accumulate_steps = 3
    conv_kernel, conv_stride = 3, 2
    Ho = (H - conv_kernel) // conv_stride + 1   # = 7

    key = jax.random.PRNGKey(0)
    k_x, k_nx, k_a, k_p = jax.random.split(key, 4)

    x = jax.random.normal(k_x, (B, C, H, W), jnp.float32)
    next_x = jax.random.normal(k_nx, (B, C, H, W), jnp.float32)
    pre_actions = jax.random.normal(
        k_a, (B, (accumulate_steps - 1) * action_dim), jnp.float32)

    enc_params, mlp_params = make_params(
        k_p, in_channels=C, num_filters=num_filters, conv_kernel=conv_kernel,
        conv_out_hw=Ho, out_dim=out_dim, action_dim=action_dim,
        accumulate_steps=accumulate_steps, hidden_dim=hidden_dim)

    fwd = jax.jit(functools.partial(
        inverse_dynamic_predictor_forward, action_dim=action_dim,
        conv_kernel=conv_kernel, conv_stride=conv_stride))
    out = jax.block_until_ready(fwd(x, next_x, pre_actions, enc_params, mlp_params))

    ref = reference_forward(x, next_x, pre_actions, enc_params, mlp_params,
                            action_dim, conv_kernel, conv_stride)
    err = float(jnp.max(jnp.abs(out - ref)))

    assert out.shape == (B, action_dim), out.shape
    assert out.dtype == jnp.float32
    # conv/FC path is f32; remaining tolerance covers the bf16 MLP operands.
    assert err < 0.1, f"max abs err vs f32 reference: {err}"
    print("KERNEL_OK")
</pallas_src>

<mosaic_0001>
module attributes {stable_mosaic.version = 11 : i64} {
  func.func @_fused_idp_kernel(%arg0: memref<784x36xf32, #tpu.memory_space<vmem>>, %arg1: memref<8x8xbf16, #tpu.memory_space<vmem>>, %arg2: memref<36x32xf32, #tpu.memory_space<vmem>>, %arg3: memref<1x32xf32, #tpu.memory_space<vmem>>, %arg4: memref<1568x32xf32, #tpu.memory_space<vmem>>, %arg5: memref<1x32xf32, #tpu.memory_space<vmem>>, %arg6: memref<32x32xbf16, #tpu.memory_space<vmem>>, %arg7: memref<32x32xbf16, #tpu.memory_space<vmem>>, %arg8: memref<8x32xbf16, #tpu.memory_space<vmem>>, %arg9: memref<1x32xf32, #tpu.memory_space<vmem>>, %arg10: memref<32x32xbf16, #tpu.memory_space<vmem>>, %arg11: memref<1x32xf32, #tpu.memory_space<vmem>>, %arg12: memref<32x128xbf16, #tpu.memory_space<vmem>>, %arg13: memref<1x128xf32, #tpu.memory_space<vmem>>, %arg14: memref<8x128xf32, #tpu.memory_space<vmem>>) attributes {dimension_semantics = [], scalar_prefetch = 0 : i64, scratch_operands = 0 : i64, tpu.core_type = #tpu.core_type<tc>} {
    %c0 = arith.constant 0 : index
    %c0_0 = arith.constant 0 : index
    %0 = vector.load %arg2[%c0, %c0_0] : memref<36x32xf32, #tpu.memory_space<vmem>>, vector<36x32xf32>
    %c0_1 = arith.constant 0 : index
    %c0_2 = arith.constant 0 : index
    %1 = vector.load %arg3[%c0_1, %c0_2] : memref<1x32xf32, #tpu.memory_space<vmem>>, vector<1x32xf32>
    %cst = arith.constant 0.000000e+00 : f32
    %2 = vector.broadcast %cst : f32 to vector<16x32xf32>
    %c0_3 = arith.constant 0 : index
    %c0_4 = arith.constant 0 : index
    %3 = vector.load %arg0[%c0_3, %c0_4] : memref<784x36xf32, #tpu.memory_space<vmem>>, vector<128x36xf32>
    %cst_5 = arith.constant dense<0.000000e+00> : vector<128x32xf32>
    %4 = tpu.matmul %3, %0, %cst_5 {dimension_numbers = #tpu.dot_dimension_numbers<[1], [0], [0], [1], [0, 0, 1, 1], [], []>} : vector<128x36xf32>, vector<36x32xf32>, vector<128x32xf32> -> vector<128x32xf32>
    %5 = vector.broadcast %1 : vector<1x32xf32> to vector<128x32xf32>
    %6 = arith.addf %4, %5 : vector<128x32xf32>
    %cst_6 = arith.constant 0.000000e+00 : f32
    %7 = vector.broadcast %cst_6 : f32 to vector<128x32xf32>
    %8 = arith.maximumf %6, %7 : vector<128x32xf32>
    %9 = vector.extract_strided_slice %8 {offsets = [0, 0], sizes = [16, 32], strides = [1, 1]} : vector<128x32xf32> to vector<16x32xf32>
    %c0_7 = arith.constant 0 : index
    %c0_8 = arith.constant 0 : index
    %10 = vector.load %arg4[%c0_7, %c0_8] : memref<1568x32xf32, #tpu.memory_space<vmem>>, vector<32x32xf32>
    %cst_9 = arith.constant dense<0.000000e+00> : vector<16x32xf32>
    %11 = tpu.matmul %9, %10, %cst_9 {dimension_numbers = #tpu.dot_dimension_numbers<[1], [0], [0], [1], [0, 0, 1, 1], [], []>} : vector<16x32xf32>, vector<32x32xf32>, vector<16x32xf32> -> vector<16x32xf32>
    %12 = arith.addf %2, %11 : vector<16x32xf32>
    %13 = vector.extract_strided_slice %8 {offsets = [16, 0], sizes = [16, 32], strides = [1, 1]} : vector<128x32xf32> to vector<16x32xf32>
    %c32 = arith.constant 32 : index
    %c0_10 = arith.constant 0 : index
    %14 = vector.load %arg4[%c32, %c0_10] : memref<1568x32xf32, #tpu.memory_space<vmem>>, vector<32x32xf32>
    %cst_11 = arith.constant dense<0.000000e+00> : vector<16x32xf32>
    %15 = tpu.matmul %13, %14, %cst_11 {dimension_numbers = #tpu.dot_dimension_numbers<[1], [0], [0], [1], [0, 0, 1, 1], [], []>} : vector<16x32xf32>, vector<32x32xf32>, vector<16x32xf32> -> vector<16x32xf32>
    %16 = arith.addf %12, %15 : vector<16x32xf32>
    %17 = vector.extract_strided_slice %8 {offsets = [32, 0], sizes = [16, 32], strides = [1, 1]} : vector<128x32xf32> to vector<16x32xf32>
    %c64 = arith.constant 64 : index
    %c0_12 = arith.constant 0 : index
    %18 = vector.load %arg4[%c64, %c0_12] : memref<1568x32xf32, #tpu.memory_space<vmem>>, vector<32x32xf32>
    %cst_13 = arith.constant dense<0.000000e+00> : vector<16x32xf32>
    %19 = tpu.matmul %17, %18, %cst_13 {dimension_numbers = #tpu.dot_dimension_numbers<[1], [0], [0], [1], [0, 0, 1, 1], [], []>} : vector<16x32xf32>, vector<32x32xf32>, vector<16x32xf32> -> vector<16x32xf32>
    %20 = arith.addf %16, %19 : vector<16x32xf32>
    %21 = vector.extract_strided_slice %8 {offsets = [48, 0], sizes = [16, 32], strides = [1, 1]} : vector<128x32xf32> to vector<16x32xf32>
    %c96 = arith.constant 96 : index
    %c0_14 = arith.constant 0 : index
    %22 = vector.load %arg4[%c96, %c0_14] : memref<1568x32xf32, #tpu.memory_space<vmem>>, vector<32x32xf32>
    %cst_15 = arith.constant dense<0.000000e+00> : vector<16x32xf32>
    %23 = tpu.matmul %21, %22, %cst_15 {dimension_numbers = #tpu.dot_dimension_numbers<[1], [0], [0], [1], [0, 0, 1, 1], [], []>} : vector<16x32xf32>, vector<32x32xf32>, vector<16x32xf32> -> vector<16x32xf32>
    %24 = arith.addf %20, %23 : vector<16x32xf32>
    %25 = vector.extract_strided_slice %8 {offsets = [64, 0], sizes = [16, 32], strides = [1, 1]} : vector<128x32xf32> to vector<16x32xf32>
    %c128 = arith.constant 128 : index
    %c0_16 = arith.constant 0 : index
    %26 = vector.load %arg4[%c128, %c0_16] : memref<1568x32xf32, #tpu.memory_space<vmem>>, vector<32x32xf32>
    %cst_17 = arith.constant dense<0.000000e+00> : vector<16x32xf32>
    %27 = tpu.matmul %25, %26, %cst_17 {dimension_numbers = #tpu.dot_dimension_numbers<[1], [0], [0], [1], [0, 0, 1, 1], [], []>} : vector<16x32xf32>, vector<32x32xf32>, vector<16x32xf32> -> vector<16x32xf32>
    %28 = arith.addf %24, %27 : vector<16x32xf32>
    %29 = vector.extract_strided_slice %8 {offsets = [80, 0], sizes = [16, 32], strides = [1, 1]} : vector<128x32xf32> to vector<16x32xf32>
    %c160 = arith.constant 160 : index
    %c0_18 = arith.constant 0 : index
    %30 = vector.load %arg4[%c160, %c0_18] : memref<1568x32xf32, #tpu.memory_space<vmem>>, vector<32x32xf32>
    %cst_19 = arith.constant dense<0.000000e+00> : vector<16x32xf32>
    %31 = tpu.matmul %29, %30, %cst_19 {dimension_numbers = #tpu.dot_dimension_numbers<[1], [0], [0], [1], [0, 0, 1, 1], [], []>} : vector<16x32xf32>, vector<32x32xf32>, vector<16x32xf32> -> vector<16x32xf32>
    %32 = arith.addf %28, %31 : vector<16x32xf32>
    %33 = vector.extract_strided_slice %8 {offsets = [96, 0], sizes = [16, 32], strides = [1, 1]} : vector<128x32xf32> to vector<16x32xf32>
    %c192 = arith.constant 192 : index
    %c0_20 = arith.constant 0 : index
    %34 = vector.load %arg4[%c192, %c0_20] : memref<1568x32xf32, #tpu.memory_space<vmem>>, vector<32x32xf32>
    %cst_21 = arith.constant dense<0.000000e+00> : vector<16x32xf32>
    %35 = tpu.matmul %33, %34, %cst_21 {dimension_numbers = #tpu.dot_dimension_numbers<[1], [0], [0], [1], [0, 0, 1, 1], [], []>} : vector<16x32xf32>, vector<32x32xf32>, vector<16x32xf32> -> vector<16x32xf32>
    %36 = arith.addf %32, %35 : vector<16x32xf32>
    %37 = vector.extract_strided_slice %8 {offsets = [112, 0], sizes = [16, 32], strides = [1, 1]} : vector<128x32xf32> to vector<16x32xf32>
    %c224 = arith.constant 224 : index
    %c0_22 = arith.constant 0 : index
    %38 = vector.load %arg4[%c224, %c0_22] : memref<1568x32xf32, #tpu.memory_space<vmem>>, vector<32x32xf32>
    %cst_23 = arith.constant dense<0.000000e+00> : vector<16x32xf32>
    %39 = tpu.matmul %37, %38, %cst_23 {dimension_numbers = #tpu.dot_dimension_numbers<[1], [0], [0], [1], [0, 0, 1, 1], [], []>} : vector<16x32xf32>, vector<32x32xf32>, vector<16x32xf32> -> vector<16x32xf32>
    %40 = arith.addf %36, %39 : vector<16x32xf32>
    %c128_24 = arith.constant 128 : index
    %c0_25 = arith.constant 0 : index
    %41 = vector.load %arg0[%c128_24, %c0_25] : memref<784x36xf32, #tpu.memory_space<vmem>>, vector<128x36xf32>
    %cst_26 = arith.constant dense<0.000000e+00> : vector<128x32xf32>
    %42 = tpu.matmul %41, %0, %cst_26 {dimension_numbers = #tpu.dot_dimension_numbers<[1], [0], [0], [1], [0, 0, 1, 1], [], []>} : vector<128x36xf32>, vector<36x32xf32>, vector<128x32xf32> -> vector<128x32xf32>
    %43 = vector.broadcast %1 : vector<1x32xf32> to vector<128x32xf32>
    %44 = arith.addf %42, %43 : vector<128x32xf32>
    %cst_27 = arith.constant 0.000000e+00 : f32
    %45 = vector.broadcast %cst_27 : f32 to vector<128x32xf32>
    %46 = arith.maximumf %44, %45 : vector<128x32xf32>
    %47 = vector.extract_strided_slice %46 {offsets = [0, 0], sizes = [16, 32], strides = [1, 1]} : vector<128x32xf32> to vector<16x32xf32>
    %c256 = arith.constant 256 : index
    %c0_28 = arith.constant 0 : index
    %48 = vector.load %arg4[%c256, %c0_28] : memref<1568x32xf32, #tpu.memory_space<vmem>>, vector<32x32xf32>
    %cst_29 = arith.constant dense<0.000000e+00> : vector<16x32xf32>
    %49 = tpu.matmul %47, %48, %cst_29 {dimension_numbers = #tpu.dot_dimension_numbers<[1], [0], [0], [1], [0, 0, 1, 1], [], []>} : vector<16x32xf32>, vector<32x32xf32>, vector<16x32xf32> -> vector<16x32xf32>
    %50 = arith.addf %40, %49 : vector<16x32xf32>
    %51 = vector.extract_strided_slice %46 {offsets = [16, 0], sizes = [16, 32], strides = [1, 1]} : vector<128x32xf32> to vector<16x32xf32>
    %c288 = arith.constant 288 : index
    %c0_30 = arith.constant 0 : index
    %52 = vector.load %arg4[%c288, %c0_30] : memref<1568x32xf32, #tpu.memory_space<vmem>>, vector<32x32xf32>
    %cst_31 = arith.constant dense<0.000000e+00> : vector<16x32xf32>
    %53 = tpu.matmul %51, %52, %cst_31 {dimension_numbers = #tpu.dot_dimension_numbers<[1], [0], [0], [1], [0, 0, 1, 1], [], []>} : vector<16x32xf32>, vector<32x32xf32>, vector<16x32xf32> -> vector<16x32xf32>
    %54 = arith.addf %50, %53 : vector<16x32xf32>
    %55 = vector.extract_strided_slice %46 {offsets = [32, 0], sizes = [16, 32], strides = [1, 1]} : vector<128x32xf32> to vector<16x32xf32>
    %c320 = arith.constant 320 : index
    %c0_32 = arith.constant 0 : index
    %56 = vector.load %arg4[%c320, %c0_32] : memref<1568x32xf32, #tpu.memory_space<vmem>>, vector<32x32xf32>
    %cst_33 = arith.constant dense<0.000000e+00> : vector<16x32xf32>
    %57 = tpu.matmul %55, %56, %cst_33 {dimension_numbers = #tpu.dot_dimension_numbers<[1], [0], [0], [1], [0, 0, 1, 1], [], []>} : vector<16x32xf32>, vector<32x32xf32>, vector<16x32xf32> -> vector<16x32xf32>
    %58 = arith.addf %54, %57 : vector<16x32xf32>
    %59 = vector.extract_strided_slice %46 {offsets = [48, 0], sizes = [16, 32], strides = [1, 1]} : vector<128x32xf32> to vector<16x32xf32>
    %c352 = arith.constant 352 : index
    %c0_34 = arith.constant 0 : index
    %60 = vector.load %arg4[%c352, %c0_34] : memref<1568x32xf32, #tpu.memory_space<vmem>>, vector<32x32xf32>
    %cst_35 = arith.constant dense<0.000000e+00> : vector<16x32xf32>
    %61 = tpu.matmul %59, %60, %cst_35 {dimension_numbers = #tpu.dot_dimension_numbers<[1], [0], [0], [1], [0, 0, 1, 1], [], []>} : vector<16x32xf32>, vector<32x32xf32>, vector<16x32xf32> -> vector<16x32xf32>
    %62 = arith.addf %58, %61 : vector<16x32xf32>
    %63 = vector.extract_strided_slice %46 {offsets = [64, 0], sizes = [16, 32], strides = [1, 1]} : vector<128x32xf32> to vector<16x32xf32>
    %c384 = arith.constant 384 : index
    %c0_36 = arith.constant 0 : index
    %64 = vector.load %arg4[%c384, %c0_36] : memref<1568x32xf32, #tpu.memory_space<vmem>>, vector<32x32xf32>
    %cst_37 = arith.constant dense<0.000000e+00> : vector<16x32xf32>
    %65 = tpu.matmul %63, %64, %cst_37 {dimension_numbers = #tpu.dot_dimension_numbers<[1], [0], [0], [1], [0, 0, 1, 1], [], []>} : vector<16x32xf32>, vector<32x32xf32>, vector<16x32xf32> -> vector<16x32xf32>
    %66 = arith.addf %62, %65 : vector<16x32xf32>
    %67 = vector.extract_strided_slice %46 {offsets = [80, 0], sizes = [16, 32], strides = [1, 1]} : vector<128x32xf32> to vector<16x32xf32>
    %c416 = arith.constant 416 : index
    %c0_38 = arith.constant 0 : index
    %68 = vector.load %arg4[%c416, %c0_38] : memref<1568x32xf32, #tpu.memory_space<vmem>>, vector<32x32xf32>
    %cst_39 = arith.constant dense<0.000000e+00> : vector<16x32xf32>
    %69 = tpu.matmul %67, %68, %cst_39 {dimension_numbers = #tpu.dot_dimension_numbers<[1], [0], [0], [1], [0, 0, 1, 1], [], []>} : vector<16x32xf32>, vector<32x32xf32>, vector<16x32xf32> -> vector<16x32xf32>
    %70 = arith.addf %66, %69 : vector<16x32xf32>
    %71 = vector.extract_strided_slice %46 {offsets = [96, 0], sizes = [16, 32], strides = [1, 1]} : vector<128x32xf32> to vector<16x32xf32>
    %c448 = arith.constant 448 : index
    %c0_40 = arith.constant 0 : index
    %72 = vector.load %arg4[%c448, %c0_40] : memref<1568x32xf32, #tpu.memory_space<vmem>>, vector<32x32xf32>
    %cst_41 = arith.constant dense<0.000000e+00> : vector<16x32xf32>
    %73 = tpu.matmul %71, %72, %cst_41 {dimension_numbers = #tpu.dot_dimension_numbers<[1], [0], [0], [1], [0, 0, 1, 1], [], []>} : vector<16x32xf32>, vector<32x32xf32>, vector<16x32xf32> -> vector<16x32xf32>
    %74 = arith.addf %70, %73 : vector<16x32xf32>
    %75 = vector.extract_strided_slice %46 {offsets = [112, 0], sizes = [16, 32], strides = [1, 1]} : vector<128x32xf32> to vector<16x32xf32>
    %c480 = arith.constant 480 : index
    %c0_42 = arith.constant 0 : index
    %76 = vector.load %arg4[%c480, %c0_42] : memref<1568x32xf32, #tpu.memory_space<vmem>>, vector<32x32xf32>
    %cst_43 = arith.constant dense<0.000000e+00> : vector<16x32xf32>
    %77 = tpu.matmul %75, %76, %cst_43 {dimension_numbers = #tpu.dot_dimension_numbers<[1], [0], [0], [1], [0, 0, 1, 1], [], []>} : vector<16x32xf32>, vector<32x32xf32>, vector<16x32xf32> -> vector<16x32xf32>
    %78 = arith.addf %74, %77 : vector<16x32xf32>
    %c256_44 = arith.constant 256 : index
    %c0_45 = arith.constant 0 : index
    %79 = vector.load %arg0[%c256_44, %c0_45] : memref<784x36xf32, #tpu.memory_space<vmem>>, vector<128x36xf32>
    %cst_46 = arith.constant dense<0.000000e+00> : vector<128x32xf32>
    %80 = tpu.matmul %79, %0, %cst_46 {dimension_numbers = #tpu.dot_dimension_numbers<[1], [0], [0], [1], [0, 0, 1, 1], [], []>} : vector<128x36xf32>, vector<36x32xf32>, vector<128x32xf32> -> vector<128x32xf32>
    %81 = vector.broadcast %1 : vector<1x32xf32> to vector<128x32xf32>
    %82 = arith.addf %80, %81 : vector<128x32xf32>
    %cst_47 = arith.constant 0.000000e+00 : f32
    %83 = vector.broadcast %cst_47 : f32 to vector<128x32xf32>
    %84 = arith.maximumf %82, %83 : vector<128x32xf32>
    %85 = vector.extract_strided_slice %84 {offsets = [0, 0], sizes = [16, 32], strides = [1, 1]} : vector<128x32xf32> to vector<16x32xf32>
    %c512 = arith.constant 512 : index
    %c0_48 = arith.constant 0 : index
    %86 = vector.load %arg4[%c512, %c0_48] : memref<1568x32xf32, #tpu.memory_space<vmem>>, vector<32x32xf32>
    %cst_49 = arith.constant dense<0.000000e+00> : vector<16x32xf32>
    %87 = tpu.matmul %85, %86, %cst_49 {dimension_numbers = #tpu.dot_dimension_numbers<[1], [0], [0], [1], [0, 0, 1, 1], [], []>} : vector<16x32xf32>, vector<32x32xf32>, vector<16x32xf32> -> vector<16x32xf32>
    %88 = arith.addf %78, %87 : vector<16x32xf32>
    %89 = vector.extract_strided_slice %84 {offsets = [16, 0], sizes = [16, 32], strides = [1, 1]} : vector<128x32xf32> to vector<16x32xf32>
    %c544 = arith.constant 544 : index
    %c0_50 = arith.constant 0 : index
    %90 = vector.load %arg4[%c544, %c0_50] : memref<1568x32xf32, #tpu.memory_space<vmem>>, vector<32x32xf32>
    %cst_51 = arith.constant dense<0.000000e+00> : vector<16x32xf32>
    %91 = tpu.matmul %89, %90, %cst_51 {dimension_numbers = #tpu.dot_dimension_numbers<[1], [0], [0], [1], [0, 0, 1, 1], [], []>} : vector<16x32xf32>, vector<32x32xf32>, vector<16x32xf32> -> vector<16x32xf32>
    %92 = arith.addf %88, %91 : vector<16x32xf32>
    %93 = vector.extract_strided_slice %84 {offsets = [32, 0], sizes = [16, 32], strides = [1, 1]} : vector<128x32xf32> to vector<16x32xf32>
    %c576 = arith.constant 576 : index
    %c0_52 = arith.constant 0 : index
    %94 = vector.load %arg4[%c576, %c0_52] : memref<1568x32xf32, #tpu.memory_space<vmem>>, vector<32x32xf32>
    %cst_53 = arith.constant dense<0.000000e+00> : vector<16x32xf32>
    %95 = tpu.matmul %93, %94, %cst_53 {dimension_numbers = #tpu.dot_dimension_numbers<[1], [0], [0], [1], [0, 0, 1, 1], [], []>} : vector<16x32xf32>, vector<32x32xf32>, vector<16x32xf32> -> vector<16x32xf32>
    %96 = arith.addf %92, %95 : vector<16x32xf32>
    %97 = vector.extract_strided_slice %84 {offsets = [48, 0], sizes = [16, 32], strides = [1, 1]} : vector<128x32xf32> to vector<16x32xf32>
    %c608 = arith.constant 608 : index
    %c0_54 = arith.constant 0 : index
    %98 = vector.load %arg4[%c608, %c0_54] : memref<1568x32xf32, #tpu.memory_space<vmem>>, vector<32x32xf32>
    %cst_55 = arith.constant dense<0.000000e+00> : vector<16x32xf32>
    %99 = tpu.matmul %97, %98, %cst_55 {dimension_numbers = #tpu.dot_dimension_numbers<[1], [0], [0], [1], [0, 0, 1, 1], [], []>} : vector<16x32xf32>, vector<32x32xf32>, vector<16x32xf32> -> vector<16x32xf32>
    %100 = arith.addf %96, %99 : vector<16x32xf32>
    %101 = vector.extract_strided_slice %84 {offsets = [64, 0], sizes = [16, 32], strides = [1, 1]} : vector<128x32xf32> to vector<16x32xf32>
    %c640 = arith.constant 640 : index
    %c0_56 = arith.constant 0 : index
    %102 = vector.load %arg4[%c640, %c0_56] : memref<1568x32xf32, #tpu.memory_space<vmem>>, vector<32x32xf32>
    %cst_57 = arith.constant dense<0.000000e+00> : vector<16x32xf32>
    %103 = tpu.matmul %101, %102, %cst_57 {dimension_numbers = #tpu.dot_dimension_numbers<[1], [0], [0], [1], [0, 0, 1, 1], [], []>} : vector<16x32xf32>, vector<32x32xf32>, vector<16x32xf32> -> vector<16x32xf32>
    %104 = arith.addf %100, %103 : vector<16x32xf32>
    %105 = vector.extract_strided_slice %84 {offsets = [80, 0], sizes = [16, 32], strides = [1, 1]} : vector<128x32xf32> to vector<16x32xf32>
    %c672 = arith.constant 672 : index
    %c0_58 = arith.constant 0 : index
    %106 = vector.load %arg4[%c672, %c0_58] : memref<1568x32xf32, #tpu.memory_space<vmem>>, vector<32x32xf32>
    %cst_59 = arith.constant dense<0.000000e+00> : vector<16x32xf32>
    %107 = tpu.matmul %105, %106, %cst_59 {dimension_numbers = #tpu.dot_dimension_numbers<[1], [0], [0], [1], [0, 0, 1, 1], [], []>} : vector<16x32xf32>, vector<32x32xf32>, vector<16x32xf32> -> vector<16x32xf32>
    %108 = arith.addf %104, %107 : vector<16x32xf32>
    %109 = vector.extract_strided_slice %84 {offsets = [96, 0], sizes = [16, 32], strides = [1, 1]} : vector<128x32xf32> to vector<16x32xf32>
    %c704 = arith.constant 704 : index
    %c0_60 = arith.constant 0 : index
    %110 = vector.load %arg4[%c704, %c0_60] : memref<1568x32xf32, #tpu.memory_space<vmem>>, vector<32x32xf32>
    %cst_61 = arith.constant dense<0.000000e+00> : vector<16x32xf32>
    %111 = tpu.matmul %109, %110, %cst_61 {dimension_numbers = #tpu.dot_dimension_numbers<[1], [0], [0], [1], [0, 0, 1, 1], [], []>} : vector<16x32xf32>, vector<32x32xf32>, vector<16x32xf32> -> vector<16x32xf32>
    %112 = arith.addf %108, %111 : vector<16x32xf32>
    %113 = vector.extract_strided_slice %84 {offsets = [112, 0], sizes = [16, 32], strides = [1, 1]} : vector<128x32xf32> to vector<16x32xf32>
    %c736 = arith.constant 736 : index
    %c0_62 = arith.constant 0 : index
    %114 = vector.load %arg4[%c736, %c0_62] : memref<1568x32xf32, #tpu.memory_space<vmem>>, vector<32x32xf32>
    %cst_63 = arith.constant dense<0.000000e+00> : vector<16x32xf32>
    %115 = tpu.matmul %113, %114, %cst_63 {dimension_numbers = #tpu.dot_dimension_numbers<[1], [0], [0], [1], [0, 0, 1, 1], [], []>} : vector<16x32xf32>, vector<32x32xf32>, vector<16x32xf32> -> vector<16x32xf32>
    %116 = arith.addf %112, %115 : vector<16x32xf32>
    %c384_64 = arith.constant 384 : index
    %c0_65 = arith.constant 0 : index
    %117 = vector.load %arg0[%c384_64, %c0_65] : memref<784x36xf32, #tpu.memory_space<vmem>>, vector<128x36xf32>
    %cst_66 = arith.constant dense<0.000000e+00> : vector<128x32xf32>
    %118 = tpu.matmul %117, %0, %cst_66 {dimension_numbers = #tpu.dot_dimension_numbers<[1], [0], [0], [1], [0, 0, 1, 1], [], []>} : vector<128x36xf32>, vector<36x32xf32>, vector<128x32xf32> -> vector<128x32xf32>
    %119 = vector.broadcast %1 : vector<1x32xf32> to vector<128x32xf32>
    %120 = arith.addf %118, %119 : vector<128x32xf32>
    %cst_67 = arith.constant 0.000000e+00 : f32
    %121 = vector.broadcast %cst_67 : f32 to vector<128x32xf32>
    %122 = arith.maximumf %120, %121 : vector<128x32xf32>
    %123 = vector.extract_strided_slice %122 {offsets = [0, 0], sizes = [16, 32], strides = [1, 1]} : vector<128x32xf32> to vector<16x32xf32>
    %c768 = arith.constant 768 : index
    %c0_68 = arith.constant 0 : index
    %124 = vector.load %arg4[%c768, %c0_68] : memref<1568x32xf32, #tpu.memory_space<vmem>>, vector<32x32xf32>
    %cst_69 = arith.constant dense<0.000000e+00> : vector<16x32xf32>
    %125 = tpu.matmul %123, %124, %cst_69 {dimension_numbers = #tpu.dot_dimension_numbers<[1], [0], [0], [1], [0, 0, 1, 1], [], []>} : vector<16x32xf32>, vector<32x32xf32>, vector<16x32xf32> -> vector<16x32xf32>
    %126 = arith.addf %116, %125 : vector<16x32xf32>
    %127 = vector.extract_strided_slice %122 {offsets = [16, 0], sizes = [16, 32], strides = [1, 1]} : vector<128x32xf32> to vector<16x32xf32>
    %c800 = arith.constant 800 : index
    %c0_70 = arith.constant 0 : index
    %128 = vector.load %arg4[%c800, %c0_70] : memref<1568x32xf32, #tpu.memory_space<vmem>>, vector<32x32xf32>
    %cst_71 = arith.constant dense<0.000000e+00> : vector<16x32xf32>
    %129 = tpu.matmul %127, %128, %cst_71 {dimension_numbers = #tpu.dot_dimension_numbers<[1], [0], [0], [1], [0, 0, 1, 1], [], []>} : vector<16x32xf32>, vector<32x32xf32>, vector<16x32xf32> -> vector<16x32xf32>
    %130 = arith.addf %126, %129 : vector<16x32xf32>
    %131 = vector.extract_strided_slice %122 {offsets = [32, 0], sizes = [16, 32], strides = [1, 1]} : vector<128x32xf32> to vector<16x32xf32>
    %c832 = arith.constant 832 : index
    %c0_72 = arith.constant 0 : index
    %132 = vector.load %arg4[%c832, %c0_72] : memref<1568x32xf32, #tpu.memory_space<vmem>>, vector<32x32xf32>
    %cst_73 = arith.constant dense<0.000000e+00> : vector<16x32xf32>
    %133 = tpu.matmul %131, %132, %cst_73 {dimension_numbers = #tpu.dot_dimension_numbers<[1], [0], [0], [1], [0, 0, 1, 1], [], []>} : vector<16x32xf32>, vector<32x32xf32>, vector<16x32xf32> -> vector<16x32xf32>
    %134 = arith.addf %130, %133 : vector<16x32xf32>
    %135 = vector.extract_strided_slice %122 {offsets = [48, 0], sizes = [16, 32], strides = [1, 1]} : vector<128x32xf32> to vector<16x32xf32>
    %c864 = arith.constant 864 : index
    %c0_74 = arith.constant 0 : index
    %136 = vector.load %arg4[%c864, %c0_74] : memref<1568x32xf32, #tpu.memory_space<vmem>>, vector<32x32xf32>
    %cst_75 = arith.constant dense<0.000000e+00> : vector<16x32xf32>
    %137 = tpu.matmul %135, %136, %cst_75 {dimension_numbers = #tpu.dot_dimension_numbers<[1], [0], [0], [1], [0, 0, 1, 1], [], []>} : vector<16x32xf32>, vector<32x32xf32>, vector<16x32xf32> -> vector<16x32xf32>
    %138 = arith.addf %134, %137 : vector<16x32xf32>
    %139 = vector.extract_strided_slice %122 {offsets = [64, 0], sizes = [16, 32], strides = [1, 1]} : vector<128x32xf32> to vector<16x32xf32>
    %c896 = arith.constant 896 : index
    %c0_76 = arith.constant 0 : index
    %140 = vector.load %arg4[%c896, %c0_76] : memref<1568x32xf32, #tpu.memory_space<vmem>>, vector<32x32xf32>
    %cst_77 = arith.constant dense<0.000000e+00> : vector<16x32xf32>
    %141 = tpu.matmul %139, %140, %cst_77 {dimension_numbers = #tpu.dot_dimension_numbers<[1], [0], [0], [1], [0, 0, 1, 1], [], []>} : vector<16x32xf32>, vector<32x32xf32>, vector<16x32xf32> -> vector<16x32xf32>
    %142 = arith.addf %138, %141 : vector<16x32xf32>
    %143 = vector.extract_strided_slice %122 {offsets = [80, 0], sizes = [16, 32], strides = [1, 1]} : vector<128x32xf32> to vector<16x32xf32>
    %c928 = arith.constant 928 : index
    %c0_78 = arith.constant 0 : index
    %144 = vector.load %arg4[%c928, %c0_78] : memref<1568x32xf32, #tpu.memory_space<vmem>>, vector<32x32xf32>
    %cst_79 = arith.constant dense<0.000000e+00> : vector<16x32xf32>
    %145 = tpu.matmul %143, %144, %cst_79 {dimension_numbers = #tpu.dot_dimension_numbers<[1], [0], [0], [1], [0, 0, 1, 1], [], []>} : vector<16x32xf32>, vector<32x32xf32>, vector<16x32xf32> -> vector<16x32xf32>
    %146 = arith.addf %142, %145 : vector<16x32xf32>
    %147 = vector.extract_strided_slice %122 {offsets = [96, 0], sizes = [16, 32], strides = [1, 1]} : vector<128x32xf32> to vector<16x32xf32>
    %c960 = arith.constant 960 : index
    %c0_80 = arith.constant 0 : index
    %148 = vector.load %arg4[%c960, %c0_80] : memref<1568x32xf32, #tpu.memory_space<vmem>>, vector<32x32xf32>
    %cst_81 = arith.constant dense<0.000000e+00> : vector<16x32xf32>
    %149 = tpu.matmul %147, %148, %cst_81 {dimension_numbers = #tpu.dot_dimension_numbers<[1], [0], [0], [1], [0, 0, 1, 1], [], []>} : vector<16x32xf32>, vector<32x32xf32>, vector<16x32xf32> -> vector<16x32xf32>
    %150 = arith.addf %146, %149 : vector<16x32xf32>
    %151 = vector.extract_strided_slice %122 {offsets = [112, 0], sizes = [16, 32], strides = [1, 1]} : vector<128x32xf32> to vector<16x32xf32>
    %c992 = arith.constant 992 : index
    %c0_82 = arith.constant 0 : index
    %152 = vector.load %arg4[%c992, %c0_82] : memref<1568x32xf32, #tpu.memory_space<vmem>>, vector<32x32xf32>
    %cst_83 = arith.constant dense<0.000000e+00> : vector<16x32xf32>
    %153 = tpu.matmul %151, %152, %cst_83 {dimension_numbers = #tpu.dot_dimension_numbers<[1], [0], [0], [1], [0, 0, 1, 1], [], []>} : vector<16x32xf32>, vector<32x32xf32>, vector<16x32xf32> -> vector<16x32xf32>
    %154 = arith.addf %150, %153 : vector<16x32xf32>
    %c512_84 = arith.constant 512 : index
    %c0_85 = arith.constant 0 : index
    %155 = vector.load %arg0[%c512_84, %c0_85] : memref<784x36xf32, #tpu.memory_space<vmem>>, vector<128x36xf32>
    %cst_86 = arith.constant dense<0.000000e+00> : vector<128x32xf32>
    %156 = tpu.matmul %155, %0, %cst_86 {dimension_numbers = #tpu.dot_dimension_numbers<[1], [0], [0], [1], [0, 0, 1, 1], [], []>} : vector<128x36xf32>, vector<36x32xf32>, vector<128x32xf32> -> vector<128x32xf32>
    %157 = vector.broadcast %1 : vector<1x32xf32> to vector<128x32xf32>
    %158 = arith.addf %156, %157 : vector<128x32xf32>
    %cst_87 = arith.constant 0.000000e+00 : f32
    %159 = vector.broadcast %cst_87 : f32 to vector<128x32xf32>
    %160 = arith.maximumf %158, %159 : vector<128x32xf32>
    %161 = vector.extract_strided_slice %160 {offsets = [0, 0], sizes = [16, 32], strides = [1, 1]} : vector<128x32xf32> to vector<16x32xf32>
    %c1024 = arith.constant 1024 : index
    %c0_88 = arith.constant 0 : index
    %162 = vector.load %arg4[%c1024, %c0_88] : memref<1568x32xf32, #tpu.memory_space<vmem>>, vector<32x32xf32>
    %cst_89 = arith.constant dense<0.000000e+00> : vector<16x32xf32>
    %163 = tpu.matmul %161, %162, %cst_89 {dimension_numbers = #tpu.dot_dimension_numbers<[1], [0], [0], [1], [0, 0, 1, 1], [], []>} : vector<16x32xf32>, vector<32x32xf32>, vector<16x32xf32> -> vector<16x32xf32>
    %164 = arith.addf %154, %163 : vector<16x32xf32>
    %165 = vector.extract_strided_slice %160 {offsets = [16, 0], sizes = [16, 32], strides = [1, 1]} : vector<128x32xf32> to vector<16x32xf32>
    %c1056 = arith.constant 1056 : index
    %c0_90 = arith.constant 0 : index
    %166 = vector.load %arg4[%c1056, %c0_90] : memref<1568x32xf32, #tpu.memory_space<vmem>>, vector<32x32xf32>
    %cst_91 = arith.constant dense<0.000000e+00> : vector<16x32xf32>
    %167 = tpu.matmul %165, %166, %cst_91 {dimension_numbers = #tpu.dot_dimension_numbers<[1], [0], [0], [1], [0, 0, 1, 1], [], []>} : vector<16x32xf32>, vector<32x32xf32>, vector<16x32xf32> -> vector<16x32xf32>
    %168 = arith.addf %164, %167 : vector<16x32xf32>
    %169 = vector.extract_strided_slice %160 {offsets = [32, 0], sizes = [16, 32], strides = [1, 1]} : vector<128x32xf32> to vector<16x32xf32>
    %c1088 = arith.constant 1088 : index
    %c0_92 = arith.constant 0 : index
    %170 = vector.load %arg4[%c1088, %c0_92] : memref<1568x32xf32, #tpu.memory_space<vmem>>, vector<32x32xf32>
    %cst_93 = arith.constant dense<0.000000e+00> : vector<16x32xf32>
    %171 = tpu.matmul %169, %170, %cst_93 {dimension_numbers = #tpu.dot_dimension_numbers<[1], [0], [0], [1], [0, 0, 1, 1], [], []>} : vector<16x32xf32>, vector<32x32xf32>, vector<16x32xf32> -> vector<16x32xf32>
    %172 = arith.addf %168, %171 : vector<16x32xf32>
    %173 = vector.extract_strided_slice %160 {offsets = [48, 0], sizes = [16, 32], strides = [1, 1]} : vector<128x32xf32> to vector<16x32xf32>
    %c1120 = arith.constant 1120 : index
    %c0_94 = arith.constant 0 : index
    %174 = vector.load %arg4[%c1120, %c0_94] : memref<1568x32xf32, #tpu.memory_space<vmem>>, vector<32x32xf32>
    %cst_95 = arith.constant dense<0.000000e+00> : vector<16x32xf32>
    %175 = tpu.matmul %173, %174, %cst_95 {dimension_numbers = #tpu.dot_dimension_numbers<[1], [0], [0], [1], [0, 0, 1, 1], [], []>} : vector<16x32xf32>, vector<32x32xf32>, vector<16x32xf32> -> vector<16x32xf32>
    %176 = arith.addf %172, %175 : vector<16x32xf32>
    %177 = vector.extract_strided_slice %160 {offsets = [64, 0], sizes = [16, 32], strides = [1, 1]} : vector<128x32xf32> to vector<16x32xf32>
    %c1152 = arith.constant 1152 : index
    %c0_96 = arith.constant 0 : index
    %178 = vector.load %arg4[%c1152, %c0_96] : memref<1568x32xf32, #tpu.memory_space<vmem>>, vector<32x32xf32>
    %cst_97 = arith.constant dense<0.000000e+00> : vector<16x32xf32>
    %179 = tpu.matmul %177, %178, %cst_97 {dimension_numbers = #tpu.dot_dimension_numbers<[1], [0], [0], [1], [0, 0, 1, 1], [], []>} : vector<16x32xf32>, vector<32x32xf32>, vector<16x32xf32> -> vector<16x32xf32>
    %180 = arith.addf %176, %179 : vector<16x32xf32>
    %181 = vector.extract_strided_slice %160 {offsets = [80, 0], sizes = [16, 32], strides = [1, 1]} : vector<128x32xf32> to vector<16x32xf32>
    %c1184 = arith.constant 1184 : index
    %c0_98 = arith.constant 0 : index
    %182 = vector.load %arg4[%c1184, %c0_98] : memref<1568x32xf32, #tpu.memory_space<vmem>>, vector<32x32xf32>
    %cst_99 = arith.constant dense<0.000000e+00> : vector<16x32xf32>
    %183 = tpu.matmul %181, %182, %cst_99 {dimension_numbers = #tpu.dot_dimension_numbers<[1], [0], [0], [1], [0, 0, 1, 1], [], []>} : vector<16x32xf32>, vector<32x32xf32>, vector<16x32xf32> -> vector<16x32xf32>
    %184 = arith.addf %180, %183 : vector<16x32xf32>
    %185 = vector.extract_strided_slice %160 {offsets = [96, 0], sizes = [16, 32], strides = [1, 1]} : vector<128x32xf32> to vector<16x32xf32>
    %c1216 = arith.constant 1216 : index
    %c0_100 = arith.constant 0 : index
    %186 = vector.load %arg4[%c1216, %c0_100] : memref<1568x32xf32, #tpu.memory_space<vmem>>, vector<32x32xf32>
    %cst_101 = arith.constant dense<0.000000e+00> : vector<16x32xf32>
    %187 = tpu.matmul %185, %186, %cst_101 {dimension_numbers = #tpu.dot_dimension_numbers<[1], [0], [0], [1], [0, 0, 1, 1], [], []>} : vector<16x32xf32>, vector<32x32xf32>, vector<16x32xf32> -> vector<16x32xf32>
    %188 = arith.addf %184, %187 : vector<16x32xf32>
    %189 = vector.extract_strided_slice %160 {offsets = [112, 0], sizes = [16, 32], strides = [1, 1]} : vector<128x32xf32> to vector<16x32xf32>
    %c1248 = arith.constant 1248 : index
    %c0_102 = arith.constant 0 : index
    %190 = vector.load %arg4[%c1248, %c0_102] : memref<1568x32xf32, #tpu.memory_space<vmem>>, vector<32x32xf32>
    %cst_103 = arith.constant dense<0.000000e+00> : vector<16x32xf32>
    %191 = tpu.matmul %189, %190, %cst_103 {dimension_numbers = #tpu.dot_dimension_numbers<[1], [0], [0], [1], [0, 0, 1, 1], [], []>} : vector<16x32xf32>, vector<32x32xf32>, vector<16x32xf32> -> vector<16x32xf32>
    %192 = arith.addf %188, %191 : vector<16x32xf32>
    %c640_104 = arith.constant 640 : index
    %c0_105 = arith.constant 0 : index
    %193 = vector.load %arg0[%c640_104, %c0_105] : memref<784x36xf32, #tpu.memory_space<vmem>>, vector<128x36xf32>
    %cst_106 = arith.constant dense<0.000000e+00> : vector<128x32xf32>
    %194 = tpu.matmul %193, %0, %cst_106 {dimension_numbers = #tpu.dot_dimension_numbers<[1], [0], [0], [1], [0, 0, 1, 1], [], []>} : vector<128x36xf32>, vector<36x32xf32>, vector<128x32xf32> -> vector<128x32xf32>
    %195 = vector.broadcast %1 : vector<1x32xf32> to vector<128x32xf32>
    %196 = arith.addf %194, %195 : vector<128x32xf32>
    %cst_107 = arith.constant 0.000000e+00 : f32
    %197 = vector.broadcast %cst_107 : f32 to vector<128x32xf32>
    %198 = arith.maximumf %196, %197 : vector<128x32xf32>
    %199 = vector.extract_strided_slice %198 {offsets = [0, 0], sizes = [16, 32], strides = [1, 1]} : vector<128x32xf32> to vector<16x32xf32>
    %c1280 = arith.constant 1280 : index
    %c0_108 = arith.constant 0 : index
    %200 = vector.load %arg4[%c1280, %c0_108] : memref<1568x32xf32, #tpu.memory_space<vmem>>, vector<32x32xf32>
    %cst_109 = arith.constant dense<0.000000e+00> : vector<16x32xf32>
    %201 = tpu.matmul %199, %200, %cst_109 {dimension_numbers = #tpu.dot_dimension_numbers<[1], [0], [0], [1], [0, 0, 1, 1], [], []>} : vector<16x32xf32>, vector<32x32xf32>, vector<16x32xf32> -> vector<16x32xf32>
    %202 = arith.addf %192, %201 : vector<16x32xf32>
    %203 = vector.extract_strided_slice %198 {offsets = [16, 0], sizes = [16, 32], strides = [1, 1]} : vector<128x32xf32> to vector<16x32xf32>
    %c1312 = arith.constant 1312 : index
    %c0_110 = arith.constant 0 : index
    %204 = vector.load %arg4[%c1312, %c0_110] : memref<1568x32xf32, #tpu.memory_space<vmem>>, vector<32x32xf32>
    %cst_111 = arith.constant dense<0.000000e+00> : vector<16x32xf32>
    %205 = tpu.matmul %203, %204, %cst_111 {dimension_numbers = #tpu.dot_dimension_numbers<[1], [0], [0], [1], [0, 0, 1, 1], [], []>} : vector<16x32xf32>, vector<32x32xf32>, vector<16x32xf32> -> vector<16x32xf32>
    %206 = arith.addf %202, %205 : vector<16x32xf32>
    %207 = vector.extract_strided_slice %198 {offsets = [32, 0], sizes = [16, 32], strides = [1, 1]} : vector<128x32xf32> to vector<16x32xf32>
    %c1344 = arith.constant 1344 : index
    %c0_112 = arith.constant 0 : index
    %208 = vector.load %arg4[%c1344, %c0_112] : memref<1568x32xf32, #tpu.memory_space<vmem>>, vector<32x32xf32>
    %cst_113 = arith.constant dense<0.000000e+00> : vector<16x32xf32>
    %209 = tpu.matmul %207, %208, %cst_113 {dimension_numbers = #tpu.dot_dimension_numbers<[1], [0], [0], [1], [0, 0, 1, 1], [], []>} : vector<16x32xf32>, vector<32x32xf32>, vector<16x32xf32> -> vector<16x32xf32>
    %210 = arith.addf %206, %209 : vector<16x32xf32>
    %211 = vector.extract_strided_slice %198 {offsets = [48, 0], sizes = [16, 32], strides = [1, 1]} : vector<128x32xf32> to vector<16x32xf32>
    %c1376 = arith.constant 1376 : index
    %c0_114 = arith.constant 0 : index
    %212 = vector.load %arg4[%c1376, %c0_114] : memref<1568x32xf32, #tpu.memory_space<vmem>>, vector<32x32xf32>
    %cst_115 = arith.constant dense<0.000000e+00> : vector<16x32xf32>
    %213 = tpu.matmul %211, %212, %cst_115 {dimension_numbers = #tpu.dot_dimension_numbers<[1], [0], [0], [1], [0, 0, 1, 1], [], []>} : vector<16x32xf32>, vector<32x32xf32>, vector<16x32xf32> -> vector<16x32xf32>
    %214 = arith.addf %210, %213 : vector<16x32xf32>
    %215 = vector.extract_strided_slice %198 {offsets = [64, 0], sizes = [16, 32], strides = [1, 1]} : vector<128x32xf32> to vector<16x32xf32>
    %c1408 = arith.constant 1408 : index
    %c0_116 = arith.constant 0 : index
    %216 = vector.load %arg4[%c1408, %c0_116] : memref<1568x32xf32, #tpu.memory_space<vmem>>, vector<32x32xf32>
    %cst_117 = arith.constant dense<0.000000e+00> : vector<16x32xf32>
    %217 = tpu.matmul %215, %216, %cst_117 {dimension_numbers = #tpu.dot_dimension_numbers<[1], [0], [0], [1], [0, 0, 1, 1], [], []>} : vector<16x32xf32>, vector<32x32xf32>, vector<16x32xf32> -> vector<16x32xf32>
    %218 = arith.addf %214, %217 : vector<16x32xf32>
    %219 = vector.extract_strided_slice %198 {offsets = [80, 0], sizes = [16, 32], strides = [1, 1]} : vector<128x32xf32> to vector<16x32xf32>
    %c1440 = arith.constant 1440 : index
    %c0_118 = arith.constant 0 : index
    %220 = vector.load %arg4[%c1440, %c0_118] : memref<1568x32xf32, #tpu.memory_space<vmem>>, vector<32x32xf32>
    %cst_119 = arith.constant dense<0.000000e+00> : vector<16x32xf32>
    %221 = tpu.matmul %219, %220, %cst_119 {dimension_numbers = #tpu.dot_dimension_numbers<[1], [0], [0], [1], [0, 0, 1, 1], [], []>} : vector<16x32xf32>, vector<32x32xf32>, vector<16x32xf32> -> vector<16x32xf32>
    %222 = arith.addf %218, %221 : vector<16x32xf32>
    %223 = vector.extract_strided_slice %198 {offsets = [96, 0], sizes = [16, 32], strides = [1, 1]} : vector<128x32xf32> to vector<16x32xf32>
    %c1472 = arith.constant 1472 : index
    %c0_120 = arith.constant 0 : index
    %224 = vector.load %arg4[%c1472, %c0_120] : memref<1568x32xf32, #tpu.memory_space<vmem>>, vector<32x32xf32>
    %cst_121 = arith.constant dense<0.000000e+00> : vector<16x32xf32>
    %225 = tpu.matmul %223, %224, %cst_121 {dimension_numbers = #tpu.dot_dimension_numbers<[1], [0], [0], [1], [0, 0, 1, 1], [], []>} : vector<16x32xf32>, vector<32x32xf32>, vector<16x32xf32> -> vector<16x32xf32>
    %226 = arith.addf %222, %225 : vector<16x32xf32>
    %227 = vector.extract_strided_slice %198 {offsets = [112, 0], sizes = [16, 32], strides = [1, 1]} : vector<128x32xf32> to vector<16x32xf32>
    %c1504 = arith.constant 1504 : index
    %c0_122 = arith.constant 0 : index
    %228 = vector.load %arg4[%c1504, %c0_122] : memref<1568x32xf32, #tpu.memory_space<vmem>>, vector<32x32xf32>
    %cst_123 = arith.constant dense<0.000000e+00> : vector<16x32xf32>
    %229 = tpu.matmul %227, %228, %cst_123 {dimension_numbers = #tpu.dot_dimension_numbers<[1], [0], [0], [1], [0, 0, 1, 1], [], []>} : vector<16x32xf32>, vector<32x32xf32>, vector<16x32xf32> -> vector<16x32xf32>
    %230 = arith.addf %226, %229 : vector<16x32xf32>
    %c768_124 = arith.constant 768 : index
    %c0_125 = arith.constant 0 : index
    %231 = vector.load %arg0[%c768_124, %c0_125] : memref<784x36xf32, #tpu.memory_space<vmem>>, vector<16x36xf32>
    %cst_126 = arith.constant dense<0.000000e+00> : vector<16x32xf32>
    %232 = tpu.matmul %231, %0, %cst_126 {dimension_numbers = #tpu.dot_dimension_numbers<[1], [0], [0], [1], [0, 0, 1, 1], [], []>} : vector<16x36xf32>, vector<36x32xf32>, vector<16x32xf32> -> vector<16x32xf32>
    %233 = vector.broadcast %1 : vector<1x32xf32> to vector<16x32xf32>
    %234 = arith.addf %232, %233 : vector<16x32xf32>
    %cst_127 = arith.constant 0.000000e+00 : f32
    %235 = vector.broadcast %cst_127 : f32 to vector<16x32xf32>
    %236 = arith.maximumf %234, %235 : vector<16x32xf32>
    %c1536 = arith.constant 1536 : index
    %c0_128 = arith.constant 0 : index
    %237 = vector.load %arg4[%c1536, %c0_128] : memref<1568x32xf32, #tpu.memory_space<vmem>>, vector<32x32xf32>
    %cst_129 = arith.constant dense<0.000000e+00> : vector<16x32xf32>
    %238 = tpu.matmul %236, %237, %cst_129 {dimension_numbers = #tpu.dot_dimension_numbers<[1], [0], [0], [1], [0, 0, 1, 1], [], []>} : vector<16x32xf32>, vector<32x32xf32>, vector<16x32xf32> -> vector<16x32xf32>
    %239 = arith.addf %230, %238 : vector<16x32xf32>
    %c0_130 = arith.constant 0 : index
    %c0_131 = arith.constant 0 : index
    %240 = vector.load %arg5[%c0_130, %c0_131] : memref<1x32xf32, #tpu.memory_space<vmem>>, vector<1x32xf32>
    %241 = vector.broadcast %240 : vector<1x32xf32> to vector<16x32xf32>
    %242 = arith.addf %239, %241 : vector<16x32xf32>
    %cst_132 = arith.constant 0.000000e+00 : f32
    %243 = vector.broadcast %cst_132 : f32 to vector<16x32xf32>
    %244 = arith.maximumf %242, %243 : vector<16x32xf32>
    %245 = vector.extract_strided_slice %244 {offsets = [0, 0], sizes = [8, 32], strides = [1, 1]} : vector<16x32xf32> to vector<8x32xf32>
    %246 = arith.truncf %245 : vector<8x32xf32> to vector<8x32xbf16>
    %247 = vector.extract_strided_slice %244 {offsets = [8, 0], sizes = [8, 32], strides = [1, 1]} : vector<16x32xf32> to vector<8x32xf32>
    %248 = arith.truncf %247 : vector<8x32xf32> to vector<8x32xbf16>
    %c0_133 = arith.constant 0 : index
    %c0_134 = arith.constant 0 : index
    %249 = vector.load %arg6[%c0_133, %c0_134] : memref<32x32xbf16, #tpu.memory_space<vmem>>, vector<32x32xbf16>
    %cst_135 = arith.constant dense<0.000000e+00> : vector<8x32xf32>
    %250 = tpu.matmul %246, %249, %cst_135 {dimension_numbers = #tpu.dot_dimension_numbers<[1], [0], [0], [1], [0, 0, 1, 1], [], []>} : vector<8x32xbf16>, vector<32x32xbf16>, vector<8x32xf32> -> vector<8x32xf32>
    %c0_136 = arith.constant 0 : index
    %c0_137 = arith.constant 0 : index
    %251 = vector.load %arg7[%c0_136, %c0_137] : memref<32x32xbf16, #tpu.memory_space<vmem>>, vector<32x32xbf16>
    %cst_138 = arith.constant dense<0.000000e+00> : vector<8x32xf32>
    %252 = tpu.matmul %248, %251, %cst_138 {dimension_numbers = #tpu.dot_dimension_numbers<[1], [0], [0], [1], [0, 0, 1, 1], [], []>} : vector<8x32xbf16>, vector<32x32xbf16>, vector<8x32xf32> -> vector<8x32xf32>
    %253 = arith.addf %250, %252 : vector<8x32xf32>
    %c0_139 = arith.constant 0 : index
    %c0_140 = arith.constant 0 : index
    %254 = vector.load %arg1[%c0_139, %c0_140] : memref<8x8xbf16, #tpu.memory_space<vmem>>, vector<8x8xbf16>
    %c0_141 = arith.constant 0 : index
    %c0_142 = arith.constant 0 : index
    %255 = vector.load %arg8[%c0_141, %c0_142] : memref<8x32xbf16, #tpu.memory_space<vmem>>, vector<8x32xbf16>
    %cst_143 = arith.constant dense<0.000000e+00> : vector<8x32xf32>
    %256 = tpu.matmul %254, %255, %cst_143 {dimension_numbers = #tpu.dot_dimension_numbers<[1], [0], [0], [1], [0, 0, 1, 1], [], []>} : vector<8x8xbf16>, vector<8x32xbf16>, vector<8x32xf32> -> vector<8x32xf32>
    %257 = arith.addf %253, %256 : vector<8x32xf32>
    %c0_144 = arith.constant 0 : index
    %c0_145 = arith.constant 0 : index
    %258 = vector.load %arg9[%c0_144, %c0_145] : memref<1x32xf32, #tpu.memory_space<vmem>>, vector<1x32xf32>
    %259 = vector.broadcast %258 : vector<1x32xf32> to vector<8x32xf32>
    %260 = arith.addf %257, %259 : vector<8x32xf32>
    %cst_146 = arith.constant 0.000000e+00 : f32
    %261 = vector.broadcast %cst_146 : f32 to vector<8x32xf32>
    %262 = arith.maximumf %260, %261 : vector<8x32xf32>
    %263 = arith.truncf %262 : vector<8x32xf32> to vector<8x32xbf16>
    %c0_147 = arith.constant 0 : index
    %c0_148 = arith.constant 0 : index
    %264 = vector.load %arg10[%c0_147, %c0_148] : memref<32x32xbf16, #tpu.memory_space<vmem>>, vector<32x32xbf16>
    %cst_149 = arith.constant dense<0.000000e+00> : vector<8x32xf32>
    %265 = tpu.matmul %263, %264, %cst_149 {dimension_numbers = #tpu.dot_dimension_numbers<[1], [0], [0], [1], [0, 0, 1, 1], [], []>} : vector<8x32xbf16>, vector<32x32xbf16>, vector<8x32xf32> -> vector<8x32xf32>
    %c0_150 = arith.constant 0 : index
    %c0_151 = arith.constant 0 : index
    %266 = vector.load %arg11[%c0_150, %c0_151] : memref<1x32xf32, #tpu.memory_space<vmem>>, vector<1x32xf32>
    %267 = vector.broadcast %266 : vector<1x32xf32> to vector<8x32xf32>
    %268 = arith.addf %265, %267 : vector<8x32xf32>
    %cst_152 = arith.constant 0.000000e+00 : f32
    %269 = vector.broadcast %cst_152 : f32 to vector<8x32xf32>
    %270 = arith.maximumf %268, %269 : vector<8x32xf32>
    %271 = arith.truncf %270 : vector<8x32xf32> to vector<8x32xbf16>
    %c0_153 = arith.constant 0 : index
    %c0_154 = arith.constant 0 : index
    %272 = vector.load %arg12[%c0_153, %c0_154] : memref<32x128xbf16, #tpu.memory_space<vmem>>, vector<32x128xbf16>
    %cst_155 = arith.constant dense<0.000000e+00> : vector<8x128xf32>
    %273 = tpu.matmul %271, %272, %cst_155 {dimension_numbers = #tpu.dot_dimension_numbers<[1], [0], [0], [1], [0, 0, 1, 1], [], []>} : vector<8x32xbf16>, vector<32x128xbf16>, vector<8x128xf32> -> vector<8x128xf32>
    %c0_156 = arith.constant 0 : index
    %c0_157 = arith.constant 0 : index
    %274 = vector.load %arg13[%c0_156, %c0_157] : memref<1x128xf32, #tpu.memory_space<vmem>>, vector<1x128xf32>
    %275 = vector.broadcast %274 : vector<1x128xf32> to vector<8x128xf32>
    %276 = arith.addf %273, %275 : vector<8x128xf32>
    %c0_158 = arith.constant 0 : index
    %c0_159 = arith.constant 0 : index
    %277 = vector.load %arg14[%c0_158, %c0_159] : memref<8x128xf32, #tpu.memory_space<vmem>>, vector<8x128xf32>
    tpu.vector_store %arg14[%c0_158, %c0_159], %276 {strides = array<i32>} : memref<8x128xf32, #tpu.memory_space<vmem>>, vector<8x128xf32>,
    return
  }
}

</mosaic_0001>

<bundles_post_ra>
// kernel: inverse_dynamic_predictor_forward.1
= control target key start
LH: loop header
LB: loop body
LE: loop exit
PB: predicated region body
PF: predicated region fallthrough
CT: control target
= control target key end

     0   :  { %vm76_vm0 = vcmask 293888   ;;  %vm125_vm1 = vcmask 1043456   ;;  %vm298_vm2 = vcmask 261120   ;;  %vm8103_vm3 = vmmov 0   ;;  %s9716_s2 = inlined_call_operand.vmem [shape: f32[36,32], index: 2, kind: input, shape index: {}]   ;;  %s9717_s0 = inlined_call_operand.vmem [shape: f32[784,36], index: 0, kind: input, shape index: {}]   ;;  %s9718_s4 = inlined_call_operand.vmem [shape: f32[1568,32], index: 4, kind: input, shape index: {}]   ;;  %s9719_s3 = inlined_call_operand.vmem [shape: f32[1,32], index: 3, kind: input, shape index: {}]   ;;  %s9720_s7 = inlined_call_operand.vmem [shape: bf16[32,32], index: 7, kind: input, shape index: {}]   ;;  %s9721_s6 = inlined_call_operand.vmem [shape: bf16[32,32], index: 6, kind: input, shape index: {}]   ;;  %s9722_s5 = inlined_call_operand.vmem [shape: f32[1,32], index: 5, kind: input, shape index: {}]   ;;  %s9723_s8 = inlined_call_operand.vmem [shape: bf16[8,32], index: 8, kind: input, shape index: {}]   ;;  %s9724_s1 = inlined_call_operand.vmem [shape: bf16[8,8], index: 1, kind: input, shape index: {}]   ;;  %s9725_s10 = inlined_call_operand.vmem [shape: bf16[32,32], index: 10, kind: input, shape index: {}]   ;;  %s9726_s12 = inlined_call_operand.vmem [shape: bf16[32,128], index: 12, kind: input, shape index: {}]   ;;  %s9727_s9 = inlined_call_operand.vmem [shape: f32[1,32], index: 9, kind: input, shape index: {}]   ;;  %s9728_s11 = inlined_call_operand.vmem [shape: f32[1,32], index: 11, kind: input, shape index: {}]   ;;  %s9729_s13 = inlined_call_operand.vmem [shape: f32[1,128], index: 13, kind: input, shape index: {}]   ;;  %s9730_s14 = inlined_call_operand.vmem [shape: f32[8,128], index: 14, kind: output, shape index: {}]  }
   0x1   :  { %v48_v0 = vld [vmem:[%s9716_s2] sm:$0xff]  ;;  %v49_v1 = vld [vmem:[%s9716_s2 + $0x8] sm:$0xff]  ;;  %v50_v2 = vld [vmem:[%s9716_s2 + $0x10] sm:$0xff]  ;;  %vm5893_vm4 = vcmask 64512  }
   0x2   :  { %v8188_v3 = vpack.c.bf16 %v49_v1, %v48_v0  ;;  %v51_v4 = vld [vmem:[%s9716_s2 + $0x18] sm:$0xff]  ;;  %v54_v5 = vld [vmem:[%s9717_s0] sm:$0xff]  ;;  %v295_v9 = vld [vmem:[%s9718_s4 + $0x28] sm:$0xff] }
   0x3   :  { %v8196_v6 = vpack.c.bf16 %v51_v4, %v50_v2  ;;  %6762 = vmatprep.mubr.msk.f32.mxu0 %vm76_vm0, %v54_v5  ;;  %v8205_v7 = vld [vmem:[%s9716_s2 + $0x20] sm:$0xf]  ;;  %v296_v10 = vld [vmem:[%s9718_s4 + $0x30] sm:$0xff]  ;;  %v297_v11 = vld [vmem:[%s9718_s4 + $0x38] sm:$0xff] }
   0x4   :  { %7547 = vmatprep.subr.bf16.mxu0 %v8188_v3  ;;  %v294_v8 = vld [vmem:[%s9718_s4 + $0x20] sm:$0xff]  ;;  %v55_v13 = vld [vmem:[%s9717_s0 + $0x8] sm:$0xff]  ;;  %v56_v14 = vld [vmem:[%s9717_s0 + $0x10] sm:$0xff]  ;;  %v7558_v15 = vpack.c.bf16 %v297_v11, %v296_v10 }
   0x5   :  { %7549 = vmatpush3.bf16.msra.mxu0 %v8188_v3  ;;  %v7554_v12 = vpack.c.bf16 %v295_v9, %v294_v8  ;;  %v57_v16 = vld [vmem:[%s9717_s0 + $0x18] sm:$0xff]  ;;  %v58_v17 = vld [vmem:[%s9717_s0 + $0x20] sm:$0xff]  ;;  %v59_v18 = vld [vmem:[%s9717_s0 + $0x28] sm:$0xff] }
   0x6   :  { %7551 = vmatprep.subr.bf16.mxu0 %v8196_v6  ;;  %v60_v19 = vld [vmem:[%s9717_s0 + $0x30] sm:$0xff]  ;;  %v61_v20 = vld [vmem:[%s9717_s0 + $0x38] sm:$0xff]  ;;  %v62_v21 = vld [vmem:[%s9717_s0 + $0x40] sm:$0xff] }
   0x7   :  { %v63_v22 = vld [vmem:[%s9717_s0 + $0x48] sm:$0xff]  ;;  %v64_v23 = vld [vmem:[%s9717_s0 + $0x50] sm:$0xff]  ;;  %v65_v24 = vld [vmem:[%s9717_s0 + $0x58] sm:$0xff] }
   0x8   :  { %v66_v25 = vld [vmem:[%s9717_s0 + $0x60] sm:$0xff]  ;;  %v67_v26 = vld [vmem:[%s9717_s0 + $0x68] sm:$0xff]  ;;  %v68_v27 = vld [vmem:[%s9717_s0 + $0x70] sm:$0xff] }
   0x9   :  { %7553 = vmatpush3.bf16.msra.mxu0 %v8196_v6  ;;  %v69_v28 = vld [vmem:[%s9717_s0 + $0x78] sm:$0xff]  ;;  %v290_v29 = vld [vmem:[%s9718_s4] sm:$0xff]  ;;  %v291_v30 = vld [vmem:[%s9718_s4 + $0x8] sm:$0xff] }
   0xa   :  { %6760 = vmatprep.subr.msk.mxu0 %vm125_vm1, %v8205_v7  ;;  %v7562_v31 = vpack.c.bf16 %v291_v30, %v290_v29  ;;  %v8293_v34 = vld [vmem:[%s9719_s3] ss:$0 sm:$0xff]  ;;  %v292_v40 = vld [vmem:[%s9718_s4 + $0x10] sm:$0xff]  ;;  %v293_v41 = vld [vmem:[%s9718_s4 + $0x18] sm:$0xff] }
   0xb   :  { %v7566_v45 = vpack.c.bf16 %v293_v41, %v292_v40  ;;  %v461_v48 = vld [vmem:[%s9718_s4 + $0x40] sm:$0xff]  ;;  %v462_v49 = vld [vmem:[%s9718_s4 + $0x48] sm:$0xff]  ;;  %v463_v55 = vld [vmem:[%s9718_s4 + $0x50] sm:$0xff] }
   0xc   :  { %v7570_v53 = vpack.c.bf16 %v462_v49, %v461_v48  ;;  %v464_v56 = vld [vmem:[%s9718_s4 + $0x58] sm:$0xff]  ;;  %v548_v62 = vld [vmem:[%s9718_s4 + $0x60] sm:$0xff]  ;;  %v549_v63 = vld [vmem:[%s9718_s4 + $0x68] sm:$0xff] }
   0xd   :  { %6761 = vmatpush3.msk.msra.mxu0 %vm125_vm1, %v8205_v7  ;;  %v7574_v60 = vpack.c.bf16 %v464_v56, %v463_v55  ;;  %v7578_v4 = vpack.c.bf16 %v549_v63, %v548_v62  ;;  %v550_v8 = vld [vmem:[%s9718_s4 + $0x70] sm:$0xff]  ;;  %v551_v9 = vld [vmem:[%s9718_s4 + $0x78] sm:$0xff]  ;;  %v896_v48 = vld [vmem:[%s9718_s4 + $0xe0] sm:$0xff] }
   0xe   :  { %6763 = vmatmul.mubr.msk.f32.vlgmr.msra.gmra.mrb[0].mxu0 %vm76_vm0, %v55_v13  ;;  %7555 = vmatprep.subr.bf16.mxu0 %v7554_v12  ;;  %v7582_v13 = vpack.c.bf16 %v551_v9, %v550_v8  ;;  %v897_v49 = vld [vmem:[%s9718_s4 + $0xe8] sm:$0xff]  ;;  %v985_v62 = vld [vmem:[%s9717_s0 + $0x90] sm:$0xff]  ;;  %v986_v63 = vld [vmem:[%s9717_s0 + $0x98] sm:$0xff] }
   0xf   :  { %6765 = vmatprep.mubr.msk.f32.mxu0 %vm76_vm0, %v56_v14  ;;  %7557 = vmatpush3.bf16.msra.mxu0 %v7554_v12  ;;  %v992_v8 = vld [vmem:[%s9717_s0 + $0xc8] sm:$0xff]  ;;  %v993_v9 = vld [vmem:[%s9717_s0 + $0xd0] sm:$0xff] }
  0x10   :  { %7559 = vmatprep.subr.bf16.mxu0 %v7558_v15 }
  0x12   :  { %6766 = vmatmul.mubr.msk.f32.gmra.mrb[2].mxu0 %vm76_vm0, %v57_v16  ;;  %v636_v16 = vld [vmem:[%s9718_s4 + $0x88] sm:$0xff] }
  0x13   :  { %6768 = vmatprep.mubr.msk.f32.mxu0 %vm76_vm0, %v58_v17  ;;  %7561 = vmatpush3.bf16.msra.mxu0 %v7558_v15  ;;  %v635_v15 = vld [vmem:[%s9718_s4 + $0x80] sm:$0xff] }
  0x14   :  { %7563 = vmatprep.subr.bf16.mxu0 %v7562_v31 }
  0x16   :  { %6769 = vmatmul.mubr.msk.f32.gmra.mrb[4].mxu0 %vm76_vm0, %v59_v18 }
  0x17   :  { %6771 = vmatprep.mubr.msk.f32.mxu0 %vm76_vm0, %v60_v19 }
  0x1a   :  { %6772 = vmatmul.mubr.msk.f32.gmra.mrb[6].mxu0 %vm76_vm0, %v61_v20  ;;  %v7586_v20 = vpack.c.bf16 %v636_v16, %v635_v15  ;;  %v1904_v15 = vld [vmem:[%s9717_s0 + $0x100] sm:$0xff]  ;;  %v1905_v16 = vld [vmem:[%s9717_s0 + $0x108] sm:$0xff] }
  0x1b   :  { %6774 = vmatprep.mubr.msk.f32.mxu0 %vm76_vm0, %v62_v21 }
  0x1e   :  { %6775 = vmatmul.mubr.msk.f32.gmra.mrb[8].mxu0 %vm76_vm0, %v63_v22  ;;  %v637_v22 = vld [vmem:[%s9718_s4 + $0x90] sm:$0xff] }
  0x1f   :  { %6777 = vmatprep.mubr.msk.f32.mxu0 %vm76_vm0, %v64_v23  ;;  %v638_v23 = vld [vmem:[%s9718_s4 + $0x98] sm:$0xff] }
  0x22   :  { %6778 = vmatmul.mubr.msk.f32.gmra.mrb[10].mxu0 %vm76_vm0, %v65_v24 }
  0x23   :  { %6780 = vmatprep.mubr.msk.f32.mxu0 %vm76_vm0, %v66_v25 }
  0x26   :  { %6781 = vmatmul.mubr.msk.f32.gmra.mrb[12].mxu0 %vm76_vm0, %v67_v26  ;;  %v7590_v26 = vpack.c.bf16 %v638_v23, %v637_v22  ;;  %v1911_v22 = vld [vmem:[%s9717_s0 + $0x138] sm:$0xff]  ;;  %v1912_v23 = vld [vmem:[%s9717_s0 + $0x140] sm:$0xff] }
  0x27   :  { %6783 = vmatprep.mubr.msk.f32.mxu0 %vm76_vm0, %v68_v27  ;;  %v722_v27 = vld [vmem:[%s9718_s4 + $0xa0] sm:$0xff] }
  0x2a   :  { %6784 = vmatmul.mubr.msk.f32.gmra.mrb[14].mxu0 %vm76_vm0, %v69_v28  ;;  %v723_v28 = vld [vmem:[%s9718_s4 + $0xa8] sm:$0xff] }
  0xe1   :  { %v6764_v32 = vpop.f32.mrb[0].mxu0 }
  0xe2   :  { %v195_v33 = vpop.f32.mrb[1].mxu0  ;;  %v201_v52 = vadd.f32 %v6764_v32, %v8293_v34  ;;  %v724_v32 = vld [vmem:[%s9718_s4 + $0xb0] sm:$0xff] }
  0xe3   :  { %v196_v38 = vadd.f32 %v8293_v34, %v195_v33  ;;  %v725_v33 = vld [vmem:[%s9718_s4 + $0xb8] sm:$0xff] }
  0xe4   :  { %v275_v59 = vmax.f32 %v201_v52, 0.0  ;;  %v7610_v52 = vpack.c.bf16 %v897_v49, %v896_v48  ;;  %v1210_v48 = vld [vmem:[%s9718_s4 + $0x110] sm:$0xff]  ;;  %v1211_v49 = vld [vmem:[%s9718_s4 + $0x118] sm:$0xff] }
  0xe5   :  { %v6767_v35 = vpop.f32.mrb[2].mxu0  ;;  %v274_v47 = vmax.f32 %v196_v38, 0.0  ;;  %v809_v38 = vld [vmem:[%s9718_s4 + $0xc0] sm:$0xff] }
  0xe6   :  { %v211_v36 = vadd.f32 %v6767_v35, %v8293_v34  ;;  %v205_v37 = vpop.f32.mrb[3].mxu0 }
  0xe7   :  { %v206_v39 = vadd.f32 %v8293_v34, %v205_v37  ;;  %v7598_v37 = vpack.c.bf16 %v725_v33, %v724_v32  ;;  %v2826_v32 = vld [vmem:[%s9717_s0 + $0x188] sm:$0xff]  ;;  %v2827_v33 = vld [vmem:[%s9717_s0 + $0x190] sm:$0xff] }
  0xe8   :  { %v277_v44 = vmax.f32 %v211_v36, 0.0 }
  0xe9   :  { %v276_v42 = vmax.f32 %v206_v39, 0.0  ;;  %v6770_v43 = vpop.f32.mrb[4].mxu0  ;;  %v810_v39 = vld [vmem:[%s9718_s4 + $0xc8] sm:$0xff] }
  0xea   :  { %v215_v46 = vpop.f32.mrb[5].mxu0  ;;  %v221_v2 = vadd.f32 %v6770_v43, %v8293_v34  ;;  %v811_v43 = vld [vmem:[%s9718_s4 + $0xd0] sm:$0xff] }
  0xeb   :  { %6794 = vmatprep.mubr.msk.f32.mxu0 %vm298_vm2, %v276_v42  ;;  %v216_v50 = vadd.f32 %v8293_v34, %v215_v46  ;;  %v7602_v42 = vpack.c.bf16 %v810_v39, %v809_v38  ;;  %v2831_v38 = vld [vmem:[%s9717_s0 + $0x1b0] sm:$0xff]  ;;  %v2832_v39 = vld [vmem:[%s9717_s0 + $0x1b8] sm:$0xff] }
  0xec   :  { %6795 = vmatmul.mubr.msk.f32.vlgmr.msra.gmra.mrb[16].mxu0 %vm298_vm2, %v277_v44  ;;  %v279_v12 = vmax.f32 %v221_v2, 0.0  ;;  %v812_v44 = vld [vmem:[%s9718_s4 + $0xd8] sm:$0xff]  ;;  %v989_v2 = vld [vmem:[%s9717_s0 + $0xb0] sm:$0xff] }
  0xed   :  { %7565 = vmatpush3.bf16.msra.mxu0 %v7562_v31  ;;  %6805 = vmatprep.mubr.msk.f32.mxu0 %vm298_vm2, %v274_v47  ;;  %v6773_v51 = vpop.f32.mrb[6].mxu0  ;;  %v278_v57 = vmax.f32 %v216_v50, 0.0  ;;  %v7594_v31 = vpack.c.bf16 %v723_v28, %v722_v27  ;;  %v7606_v47 = vpack.c.bf16 %v812_v44, %v811_v43  ;;  %v1916_v27 = vld [vmem:[%s9717_s0 + $0x160] sm:$0xff]  ;;  %v1917_v28 = vld [vmem:[%s9717_s0 + $0x168] sm:$0xff] }
  0xee   :  { %7567 = vmatprep.subr.bf16.mxu0 %v7566_v45  ;;  %v225_v54 = vpop.f32.mrb[7].mxu0  ;;  %v231_v19 = vadd.f32 %v6773_v51, %v8293_v34  ;;  %v2834_v44 = vld [vmem:[%s9717_s0 + $0x1c8] sm:$0xff] }
  0xef   :  { %v226_v0 = vadd.f32 %v8293_v34, %v225_v54  ;;  %v899_v54 = vld [vmem:[%s9718_s4 + $0xf8] sm:$0xff] }
  0xf0   :  { %v281_v25 = vmax.f32 %v231_v19, 0.0  ;;  %v1908_v19 = vld [vmem:[%s9717_s0 + $0x120] sm:$0xff] }
  0xf1   :  { %7569 = vmatpush3.bf16.msra.mxu0 %v7566_v45  ;;  %v6776_v58 = vpop.f32.mrb[8].mxu0  ;;  %v280_v10 = vmax.f32 %v226_v0, 0.0  ;;  %v987_v0 = vld [vmem:[%s9717_s0 + $0xa0] sm:$0xff] }
  0xf2   :  { %7571 = vmatprep.subr.bf16.mxu0 %v7570_v53  ;;  %v235_v61 = vpop.f32.mrb[9].mxu0  ;;  %v241_v30 = vadd.f32 %v6776_v58, %v8293_v34 }
  0xf3   :  { %v236_v17 = vadd.f32 %v8293_v34, %v235_v61  ;;  %v984_v61 = vld [vmem:[%s9717_s0 + $0x88] sm:$0xff] }
  0xf4   :  { %6806 = vmatmul.mubr.msk.f32.vlgmr.msra.gmra.mrb[16].mxu0 %vm298_vm2, %v275_v59  ;;  %v283_v36 = vmax.f32 %v241_v30, 0.0  ;;  %v1919_v30 = vld [vmem:[%s9717_s0 + $0x178] sm:$0xff] }
  0xf5   :  { %7573 = vmatpush3.bf16.msra.mxu0 %v7570_v53  ;;  %6816 = vmatprep.mubr.msk.f32.mxu0 %vm298_vm2, %v278_v57  ;;  %v6779_v1 = vpop.f32.mrb[10].mxu0  ;;  %v282_v24 = vmax.f32 %v236_v17, 0.0  ;;  %v898_v53 = vld [vmem:[%s9718_s4 + $0xf0] sm:$0xff] }
  0xf6   :  { %7575 = vmatprep.subr.bf16.mxu0 %v7574_v60  ;;  %v245_v5 = vpop.f32.mrb[11].mxu0  ;;  %v251_v41 = vadd.f32 %v6779_v1, %v8293_v34  ;;  %v7614_v57 = vpack.c.bf16 %v899_v54, %v898_v53  ;;  %v988_v1 = vld [vmem:[%s9717_s0 + $0xa8] sm:$0xff]  ;;  %v1906_v17 = vld [vmem:[%s9717_s0 + $0x110] sm:$0xff]  ;;  %v1295_v53 = vld [vmem:[%s9718_s4 + $0x120] sm:$0xff] }
  0xf7   :  { %v246_v29 = vadd.f32 %v8293_v34, %v245_v5  ;;  %v991_v5 = vld [vmem:[%s9717_s0 + $0xc0] sm:$0xff]  ;;  %v1296_v54 = vld [vmem:[%s9718_s4 + $0x128] sm:$0xff] }
  0xf8   :  { %v285_v46 = vmax.f32 %v251_v41, 0.0  ;;  %v1208_v41 = vld [vmem:[%s9718_s4 + $0x100] sm:$0xff] }
  0xf9   :  { %7577 = vmatpush3.bf16.msra.mxu0 %v7574_v60  ;;  %v6782_v11 = vpop.f32.mrb[12].mxu0  ;;  %v284_v35 = vmax.f32 %v246_v29, 0.0  ;;  %v983_v60 = vld [vmem:[%s9717_s0 + $0x80] sm:$0xff]  ;;  %v1918_v29 = vld [vmem:[%s9717_s0 + $0x170] sm:$0xff] }
  0xfa   :  { %7579 = vmatprep.subr.bf16.mxu0 %v7578_v4  ;;  %v255_v14 = vpop.f32.mrb[13].mxu0  ;;  %v261_v51 = vadd.f32 %v6782_v11, %v8293_v34  ;;  %v995_v11 = vld [vmem:[%s9717_s0 + $0xe0] sm:$0xff] }
  0xfb   :  { %v256_v40 = vadd.f32 %v8293_v34, %v255_v14  ;;  %v998_v14 = vld [vmem:[%s9717_s0 + $0xf8] sm:$0xff] }
  0xfc   :  { %6817 = vmatmul.mubr.msk.f32.vlgmr.msra.gmra.mrb[16].mxu0 %vm298_vm2, %v279_v12  ;;  %v287_v56 = vmax.f32 %v261_v51, 0.0  ;;  %v996_v12 = vld [vmem:[%s9717_s0 + $0xe8] sm:$0xff] }
  0xfd   :  { %7581 = vmatpush3.bf16.msra.mxu0 %v7578_v4  ;;  %6827 = vmatprep.mubr.msk.f32.mxu0 %vm298_vm2, %v280_v10  ;;  %v8346_v18 = vpop.f32.mrb[14].mxu0  ;;  %v286_v45 = vmax.f32 %v256_v40, 0.0  ;;  %v990_v4 = vld [vmem:[%s9717_s0 + $0xb8] sm:$0xff]  ;;  %v2833_v40 = vld [vmem:[%s9717_s0 + $0x1c0] sm:$0xff]  ;;  %v2838_v51 = vld [vmem:[%s9717_s0 + $0x1e8] sm:$0xff] }
  0xfe   :  { %7583 = vmatprep.subr.bf16.mxu0 %v7582_v13  ;;  %v265_v21 = vpop.f32.mrb[15].mxu0  ;;  %v271_v58 = vadd.f32 %v8346_v18, %v8293_v34  ;;  %v994_v10 = vld [vmem:[%s9717_s0 + $0xd8] sm:$0xff] }
  0xff   :  { %v266_v50 = vadd.f32 %v8293_v34, %v265_v21  ;;  %v1907_v18 = vld [vmem:[%s9717_s0 + $0x118] sm:$0xff]  ;;  %v1910_v21 = vld [vmem:[%s9717_s0 + $0x130] sm:$0xff] }
 0x100   :  { %v289_v59 = vmax.f32 %v271_v58, 0.0  ;;  %v3747_v58 = vld [vmem:[%s9717_s0 + $0x208] sm:$0xff] }
 0x101   :  { %7585 = vmatpush3.bf16.msra.mxu0 %v7582_v13  ;;  %v288_v55 = vmax.f32 %v266_v50, 0.0  ;;  %v997_v13 = vld [vmem:[%s9717_s0 + $0xf0] sm:$0xff]  ;;  %v7630_v50 = vpack.c.bf16 %v1211_v49, %v1210_v48 }
 0x102   :  { %7587 = vmatprep.subr.bf16.mxu0 %v7586_v20 }
 0x104   :  { %6828 = vmatmul.mubr.msk.f32.vlgmr.msra.gmra.mrb[16].mxu0 %vm298_vm2, %v281_v25  ;;  %v1914_v25 = vld [vmem:[%s9717_s0 + $0x150] sm:$0xff] }
 0x105   :  { %7589 = vmatpush3.bf16.msra.mxu0 %v7586_v20  ;;  %6838 = vmatprep.mubr.msk.f32.mxu0 %vm298_vm2, %v282_v24  ;;  %v1909_v20 = vld [vmem:[%s9717_s0 + $0x128] sm:$0xff] }
 0x106   :  { %7591 = vmatprep.subr.bf16.mxu0 %v7590_v26  ;;  %v1913_v24 = vld [vmem:[%s9717_s0 + $0x148] sm:$0xff] }
 0x109   :  { %7593 = vmatpush3.bf16.msra.mxu0 %v7590_v26  ;;  %v1915_v26 = vld [vmem:[%s9717_s0 + $0x158] sm:$0xff] }
 0x10a   :  { %7595 = vmatprep.subr.bf16.mxu0 %v7594_v31 }
 0x10c   :  { %6839 = vmatmul.mubr.msk.f32.vlgmr.msra.gmra.mrb[16].mxu0 %vm298_vm2, %v283_v36  ;;  %v2829_v36 = vld [vmem:[%s9717_s0 + $0x1a0] sm:$0xff] }
 0x10d   :  { %7597 = vmatpush3.bf16.msra.mxu0 %v7594_v31  ;;  %6849 = vmatprep.mubr.msk.f32.mxu0 %vm298_vm2, %v284_v35  ;;  %v2825_v31 = vld [vmem:[%s9717_s0 + $0x180] sm:$0xff]  ;;  %v2828_v35 = vld [vmem:[%s9717_s0 + $0x198] sm:$0xff] }
 0x10e   :  { %7599 = vmatprep.subr.bf16.mxu0 %v7598_v37 }
 0x111   :  { %7601 = vmatpush3.bf16.msra.mxu0 %v7598_v37  ;;  %v2830_v37 = vld [vmem:[%s9717_s0 + $0x1a8] sm:$0xff] }
 0x112   :  { %7603 = vmatprep.subr.bf16.mxu0 %v7602_v42 }
 0x114   :  { %6850 = vmatmul.mubr.msk.f32.vlgmr.msra.gmra.mrb[16].mxu0 %vm298_vm2, %v285_v46  ;;  %v2836_v46 = vld [vmem:[%s9717_s0 + $0x1d8] sm:$0xff] }
 0x115   :  { %7605 = vmatpush3.bf16.msra.mxu0 %v7602_v42  ;;  %6860 = vmatprep.mubr.msk.f32.mxu0 %vm298_vm2, %v286_v45  ;;  %v1209_v42 = vld [vmem:[%s9718_s4 + $0x108] sm:$0xff]  ;;  %v2835_v45 = vld [vmem:[%s9717_s0 + $0x1d0] sm:$0xff] }
 0x116   :  { %7607 = vmatprep.subr.bf16.mxu0 %v7606_v47  ;;  %v7626_v43 = vpack.c.bf16 %v1209_v42, %v1208_v41  ;;  %v1382_v42 = vld [vmem:[%s9718_s4 + $0x140] sm:$0xff] }
 0x118   :  { %7627 = vmatprep.subr.bf16.mxu1 %v7626_v43 }
 0x119   :  { %7609 = vmatpush3.bf16.msra.mxu0 %v7606_v47  ;;  %7629 = vmatpush3.bf16.msra.mxu1 %v7626_v43  ;;  %v2837_v47 = vld [vmem:[%s9717_s0 + $0x1e0] sm:$0xff]  ;;  %v1383_v43 = vld [vmem:[%s9718_s4 + $0x148] sm:$0xff] }
 0x11a   :  { %7611 = vmatprep.subr.bf16.mxu0 %v7610_v52  ;;  %7631 = vmatprep.subr.bf16.mxu1 %v7630_v50 }
 0x11c   :  { %6861 = vmatmul.mubr.msk.f32.vlgmr.msra.gmra.mrb[16].mxu0 %vm298_vm2, %v287_v56  ;;  %v2840_v56 = vld [vmem:[%s9717_s0 + $0x1f8] sm:$0xff] }
 0x11d   :  { %7613 = vmatpush3.bf16.msra.mxu0 %v7610_v52  ;;  %6871 = vmatprep.mubr.msk.f32.mxu0 %vm298_vm2, %v288_v55  ;;  %v2839_v52 = vld [vmem:[%s9717_s0 + $0x1f0] sm:$0xff]  ;;  %v8646_v55 = vpack.c.bf16 %v1296_v54, %v1295_v53 }
 0x11e   :  { %7615 = vmatprep.subr.bf16.mxu0 %v7614_v57  ;;  %7633 = vmatpush3.bf16.msra.mxu1 %v7630_v50  ;;  %v1384_v50 = vld [vmem:[%s9718_s4 + $0x150] sm:$0xff] }
 0x11f   :  { %7635 = vmatprep.subr.bf16.mxu1 %v8646_v55 }
 0x121   :  { %7617 = vmatpush3.bf16.msra.mxu0 %v7614_v57  ;;  %v3746_v57 = vld [vmem:[%s9717_s0 + $0x200] sm:$0xff] }
 0x122   :  { %7619 = vmatprep.subr.bf16.mxu0 %v8188_v3 }
 0x124   :  { %6872 = vmatmul.mubr.msk.f32.vlgmr.msra.gmra.mrb[16].mxu0 %vm298_vm2, %v289_v59  ;;  %v3748_v59 = vld [vmem:[%s9717_s0 + $0x210] sm:$0xff] }
 0x125   :  { %7621 = vmatpush3.bf16.msra.mxu0 %v8188_v3  ;;  %6884 = vmatprep.mubr.msk.f32.mxu0 %vm76_vm0, %v983_v60  ;;  %v3749_v60 = vld [vmem:[%s9717_s0 + $0x218] sm:$0xff] }
 0x126   :  { %7623 = vmatprep.subr.bf16.mxu0 %v8196_v6 }
 0x129   :  { %7625 = vmatpush3.bf16.msra.mxu0 %v8196_v6 }
 0x12a   :  { %6882 = vmatprep.subr.msk.mxu0 %vm125_vm1, %v8205_v7 }
 0x12d   :  { %6883 = vmatpush3.msk.msra.mxu0 %vm125_vm1, %v8205_v7 }
 0x12e   :  { %6885 = vmatmul.mubr.msk.f32.vlgmr.msra.gmra.mrb[18].mxu0 %vm76_vm0, %v984_v61  ;;  %7691 = vmatprep.subr.bf16.mxu0 %v8188_v3  ;;  %v3750_v61 = vld [vmem:[%s9717_s0 + $0x220] sm:$0xff] }
 0x12f   :  { %6887 = vmatprep.mubr.msk.f32.mxu0 %vm76_vm0, %v985_v62  ;;  %7693 = vmatpush3.bf16.msra.mxu0 %v8188_v3  ;;  %v3751_v62 = vld [vmem:[%s9717_s0 + $0x228] sm:$0xff] }
 0x130   :  { %7695 = vmatprep.subr.bf16.mxu0 %v8196_v6 }
 0x132   :  { %6888 = vmatmul.mubr.msk.f32.gmra.mrb[20].mxu0 %vm76_vm0, %v986_v63  ;;  %v3752_v63 = vld [vmem:[%s9717_s0 + $0x230] sm:$0xff] }
 0x133   :  { %6890 = vmatprep.mubr.msk.f32.mxu0 %vm76_vm0, %v987_v0  ;;  %7697 = vmatpush3.bf16.msra.mxu0 %v8196_v6  ;;  %v3753_v0 = vld [vmem:[%s9717_s0 + $0x238] sm:$0xff] }
 0x134   :  { %7004 = vmatprep.subr.msk.mxu0 %vm125_vm1, %v8205_v7 }
 0x136   :  { %6891 = vmatmul.mubr.msk.f32.gmra.mrb[22].mxu0 %vm76_vm0, %v988_v1  ;;  %v3754_v1 = vld [vmem:[%s9717_s0 + $0x240] sm:$0xff] }
 0x137   :  { %6893 = vmatprep.mubr.msk.f32.mxu0 %vm76_vm0, %v989_v2  ;;  %7005 = vmatpush3.msk.msra.mxu0 %vm125_vm1, %v8205_v7  ;;  %v3755_v2 = vld [vmem:[%s9717_s0 + $0x248] sm:$0xff] }
 0x138   :  { %7763 = vmatprep.subr.bf16.mxu0 %v8188_v3 }
 0x13a   :  { %6894 = vmatmul.mubr.msk.f32.gmra.mrb[24].mxu0 %vm76_vm0, %v990_v4  ;;  %v3756_v4 = vld [vmem:[%s9717_s0 + $0x250] sm:$0xff] }
 0x13b   :  { %6896 = vmatprep.mubr.msk.f32.mxu0 %vm76_vm0, %v991_v5  ;;  %v3757_v5 = vld [vmem:[%s9717_s0 + $0x258] sm:$0xff] }
 0x13e   :  { %6897 = vmatmul.mubr.msk.f32.gmra.mrb[26].mxu0 %vm76_vm0, %v992_v8  ;;  %v3758_v8 = vld [vmem:[%s9717_s0 + $0x260] sm:$0xff] }
 0x13f   :  { %6899 = vmatprep.mubr.msk.f32.mxu0 %vm76_vm0, %v993_v9  ;;  %v3759_v9 = vld [vmem:[%s9717_s0 + $0x268] sm:$0xff] }
 0x142   :  { %6900 = vmatmul.mubr.msk.f32.gmra.mrb[28].mxu0 %vm76_vm0, %v994_v10  ;;  %v3760_v10 = vld [vmem:[%s9717_s0 + $0x270] sm:$0xff] }
 0x143   :  { %6902 = vmatprep.mubr.msk.f32.mxu0 %vm76_vm0, %v995_v11  ;;  %v3761_v11 = vld [vmem:[%s9717_s0 + $0x278] sm:$0xff] }
 0x146   :  { %6903 = vmatmul.mubr.msk.f32.gmra.mrb[30].mxu0 %vm76_vm0, %v996_v12  ;;  %v4667_v12 = vld [vmem:[%s9717_s0 + $0x280] sm:$0xff] }
 0x147   :  { %6905 = vmatprep.mubr.msk.f32.mxu0 %vm76_vm0, %v997_v13  ;;  %v4668_v13 = vld [vmem:[%s9717_s0 + $0x288] sm:$0xff] }
 0x14a   :  { %6906 = vmatmul.mubr.msk.f32.gmra.mrb[32].mxu0 %vm76_vm0, %v998_v14  ;;  %v4669_v14 = vld [vmem:[%s9717_s0 + $0x290] sm:$0xff] }
 0x14b   :  { %7006 = vmatprep.mubr.msk.f32.mxu0 %vm76_vm0, %v1904_v15  ;;  %v4670_v15 = vld [vmem:[%s9717_s0 + $0x298] sm:$0xff] }
 0x14e   :  { %7007 = vmatmul.mubr.msk.f32.vlgmr.msra.gmra.mrb[34].mxu0 %vm76_vm0, %v1905_v16  ;;  %v4673_v16 = vld [vmem:[%s9717_s0 + $0x2b0] sm:$0xff] }
 0x14f   :  { %7009 = vmatprep.mubr.msk.f32.mxu0 %vm76_vm0, %v1906_v17  ;;  %7765 = vmatpush3.bf16.msra.mxu0 %v8188_v3  ;;  %v4675_v17 = vld [vmem:[%s9717_s0 + $0x2c0] sm:$0xff] }
 0x150   :  { %7767 = vmatprep.subr.bf16.mxu0 %v8196_v6 }
 0x152   :  { %7010 = vmatmul.mubr.msk.f32.gmra.mrb[36].mxu0 %vm76_vm0, %v1907_v18  ;;  %v4676_v18 = vld [vmem:[%s9717_s0 + $0x2c8] sm:$0xff] }
 0x153   :  { %7012 = vmatprep.mubr.msk.f32.mxu0 %vm76_vm0, %v1908_v19  ;;  %7769 = vmatpush3.bf16.msra.mxu0 %v8196_v6  ;;  %v4677_v19 = vld [vmem:[%s9717_s0 + $0x2d0] sm:$0xff] }
 0x154   :  { %7126 = vmatprep.subr.msk.mxu0 %vm125_vm1, %v8205_v7 }
 0x156   :  { %7013 = vmatmul.mubr.msk.f32.gmra.mrb[38].mxu0 %vm76_vm0, %v1909_v20  ;;  %v4678_v20 = vld [vmem:[%s9717_s0 + $0x2d8] sm:$0xff] }
 0x157   :  { %7015 = vmatprep.mubr.msk.f32.mxu0 %vm76_vm0, %v1910_v21  ;;  %7127 = vmatpush3.msk.msra.mxu0 %vm125_vm1, %v8205_v7  ;;  %v4679_v21 = vld [vmem:[%s9717_s0 + $0x2e0] sm:$0xff] }
 0x158   :  { %7835 = vmatprep.subr.bf16.mxu0 %v8188_v3 }
 0x15a   :  { %7016 = vmatmul.mubr.msk.f32.gmra.mrb[40].mxu0 %vm76_vm0, %v1911_v22  ;;  %v4680_v22 = vld [vmem:[%s9717_s0 + $0x2e8] sm:$0xff] }
 0x15b   :  { %7018 = vmatprep.mubr.msk.f32.mxu0 %vm76_vm0, %v1912_v23  ;;  %v4681_v23 = vld [vmem:[%s9717_s0 + $0x2f0] sm:$0xff] }
 0x15e   :  { %7019 = vmatmul.mubr.msk.f32.gmra.mrb[42].mxu0 %vm76_vm0, %v1913_v24  ;;  %v4682_v24 = vld [vmem:[%s9717_s0 + $0x2f8] sm:$0xff] }
 0x15f   :  { %7021 = vmatprep.mubr.msk.f32.mxu0 %vm76_vm0, %v1914_v25  ;;  %v5588_v25 = vld [vmem:[%s9717_s0 + $0x300] sm:$0xff] }
 0x162   :  { %7022 = vmatmul.mubr.msk.f32.gmra.mrb[44].mxu0 %vm76_vm0, %v1915_v26  ;;  %v5589_v26 = vld [vmem:[%s9717_s0 + $0x308] sm:$0xff] }
 0x163   :  { %7024 = vmatprep.mubr.msk.f32.mxu0 %vm76_vm0, %v1916_v27 }
 0x166   :  { %7025 = vmatmul.mubr.msk.f32.gmra.mrb[46].mxu0 %vm76_vm0, %v1917_v28 }
 0x167   :  { %7027 = vmatprep.mubr.msk.f32.mxu0 %vm76_vm0, %v1918_v29 }
 0x16a   :  { %7028 = vmatmul.mubr.msk.f32.gmra.mrb[48].mxu0 %vm76_vm0, %v1919_v30 }
 0x16b   :  { %7128 = vmatprep.mubr.msk.f32.mxu0 %vm76_vm0, %v2825_v31 }
 0x16e   :  { %7129 = vmatmul.mubr.msk.f32.vlgmr.msra.gmra.mrb[50].mxu0 %vm76_vm0, %v2826_v32 }
 0x16f   :  { %7131 = vmatprep.mubr.msk.f32.mxu0 %vm76_vm0, %v2827_v33  ;;  %7837 = vmatpush3.bf16.msra.mxu0 %v8188_v3  ;;  %v1297_v33 = vld [vmem:[%s9718_s4 + $0x130] sm:$0xff] }
 0x170   :  { %7839 = vmatprep.subr.bf16.mxu0 %v8196_v6 }
 0x172   :  { %7132 = vmatmul.mubr.msk.f32.gmra.mrb[52].mxu0 %vm76_vm0, %v2828_v35  ;;  %v1298_v35 = vld [vmem:[%s9718_s4 + $0x138] sm:$0xff] }
 0x173   :  { %7134 = vmatprep.mubr.msk.f32.mxu0 %vm76_vm0, %v2829_v36  ;;  %7841 = vmatpush3.bf16.msra.mxu0 %v8196_v6 }
 0x174   :  { %7248 = vmatprep.subr.msk.mxu0 %vm125_vm1, %v8205_v7 }
 0x176   :  { %7135 = vmatmul.mubr.msk.f32.gmra.mrb[54].mxu0 %vm76_vm0, %v2830_v37 }
 0x177   :  { %7137 = vmatprep.mubr.msk.f32.mxu0 %vm76_vm0, %v2831_v38  ;;  %7249 = vmatpush3.msk.msra.mxu0 %vm125_vm1, %v8205_v7 }
 0x178   :  { %7907 = vmatprep.subr.bf16.mxu0 %v8188_v3 }
 0x17a   :  { %7138 = vmatmul.mubr.msk.f32.gmra.mrb[56].mxu0 %vm76_vm0, %v2832_v39 }
 0x17b   :  { %7140 = vmatprep.mubr.msk.f32.mxu0 %vm76_vm0, %v2833_v40  ;;  %v7638_v40 = vpack.c.bf16 %v1298_v35, %v1297_v33 }
 0x17e   :  { %7141 = vmatmul.mubr.msk.f32.gmra.mrb[58].mxu0 %vm76_vm0, %v2834_v44 }
 0x17f   :  { %7143 = vmatprep.mubr.msk.f32.mxu0 %vm76_vm0, %v2835_v45 }
 0x182   :  { %7144 = vmatmul.mubr.msk.f32.gmra.mrb[60].mxu0 %vm76_vm0, %v2836_v46 }
 0x183   :  { %7146 = vmatprep.mubr.msk.f32.mxu0 %vm76_vm0, %v2837_v47  ;;  %v7642_v47 = vpack.c.bf16 %v1383_v43, %v1382_v42 }
 0x186   :  { %7147 = vmatmul.mubr.msk.f32.gmra.mrb[62].mxu0 %vm76_vm0, %v2838_v51  ;;  %v1385_v51 = vld [vmem:[%s9718_s4 + $0x158] sm:$0xff] }
 0x187   :  { %7149 = vmatprep.mubr.msk.f32.mxu0 %vm76_vm0, %v2839_v52 }
 0x18a   :  { %7150 = vmatmul.mubr.msk.f32.gmra.mrb[64].mxu0 %vm76_vm0, %v2840_v56 }
 0x18b   :  { %7250 = vmatprep.mubr.msk.f32.mxu0 %vm76_vm0, %v3746_v57  ;;  %v1469_v57 = vld [vmem:[%s9718_s4 + $0x160] sm:$0xff] }
 0x18e   :  { %7251 = vmatmul.mubr.msk.f32.vlgmr.msra.gmra.mrb[66].mxu0 %vm76_vm0, %v3747_v58  ;;  %v1470_v58 = vld [vmem:[%s9718_s4 + $0x168] sm:$0xff] }
 0x18f   :  { %7253 = vmatprep.mubr.msk.f32.mxu0 %vm76_vm0, %v3748_v59  ;;  %7909 = vmatpush3.bf16.msra.mxu0 %v8188_v3 }
 0x190   :  { %7911 = vmatprep.subr.bf16.mxu0 %v8196_v6 }
 0x192   :  { %7254 = vmatmul.mubr.msk.f32.gmra.mrb[68].mxu0 %vm76_vm0, %v3749_v60 }
 0x193   :  { %7256 = vmatprep.mubr.msk.f32.mxu0 %vm76_vm0, %v3750_v61  ;;  %7913 = vmatpush3.bf16.msra.mxu0 %v8196_v6 }
 0x194   :  { %7370 = vmatprep.subr.msk.mxu0 %vm125_vm1, %v8205_v7 }
 0x196   :  { %7257 = vmatmul.mubr.msk.f32.gmra.mrb[70].mxu0 %vm76_vm0, %v3751_v62  ;;  %v7650_v62 = vpack.c.bf16 %v1470_v58, %v1469_v57 }
 0x197   :  { %7259 = vmatprep.mubr.msk.f32.mxu0 %vm76_vm0, %v3752_v63  ;;  %7371 = vmatpush3.msk.msra.mxu0 %vm125_vm1, %v8205_v7 }
 0x198   :  { %7979 = vmatprep.subr.bf16.mxu0 %v8188_v3 }
 0x19a   :  { %7260 = vmatmul.mubr.msk.f32.gmra.mrb[72].mxu0 %vm76_vm0, %v3753_v0  ;;  %v1471_v0 = vld [vmem:[%s9718_s4 + $0x170] sm:$0xff] }
 0x19b   :  { %7262 = vmatprep.mubr.msk.f32.mxu0 %vm76_vm0, %v3754_v1  ;;  %v1472_v1 = vld [vmem:[%s9718_s4 + $0x178] sm:$0xff] }
 0x19e   :  { %7263 = vmatmul.mubr.msk.f32.gmra.mrb[74].mxu0 %vm76_vm0, %v3755_v2 }
 0x19f   :  { %7265 = vmatprep.mubr.msk.f32.mxu0 %vm76_vm0, %v3756_v4 }
 0x1a2   :  { %7266 = vmatmul.mubr.msk.f32.gmra.mrb[76].mxu0 %vm76_vm0, %v3757_v5 }
 0x1a3   :  { %7268 = vmatprep.mubr.msk.f32.mxu0 %vm76_vm0, %v3758_v8  ;;  %v7654_v8 = vpack.c.bf16 %v1472_v1, %v1471_v0 }
 0x1a6   :  { %7269 = vmatmul.mubr.msk.f32.gmra.mrb[78].mxu0 %vm76_vm0, %v3759_v9 }
 0x1a7   :  { %7271 = vmatprep.mubr.msk.f32.mxu0 %vm76_vm0, %v3760_v10  ;;  %v1556_v10 = vld [vmem:[%s9718_s4 + $0x180] sm:$0xff] }
 0x1aa   :  { %7272 = vmatmul.mubr.msk.f32.gmra.mrb[80].mxu0 %vm76_vm0, %v3761_v11  ;;  %v1557_v11 = vld [vmem:[%s9718_s4 + $0x188] sm:$0xff] }
 0x1ab   :  { %7372 = vmatprep.mubr.msk.f32.mxu0 %vm76_vm0, %v4667_v12 }
 0x1ae   :  { %7373 = vmatmul.mubr.msk.f32.vlgmr.msra.gmra.mrb[82].mxu0 %vm76_vm0, %v4668_v13 }
 0x1af   :  { %7981 = vmatpush3.bf16.msra.mxu0 %v8188_v3  ;;  %7375 = vmatprep.mubr.msk.f32.mxu0 %vm76_vm0, %v4669_v14  ;;  %v4671_v3 = vld [vmem:[%s9717_s0 + $0x2a0] sm:$0xff] }
 0x1b0   :  { %7983 = vmatprep.subr.bf16.mxu0 %v8196_v6 }
 0x1b2   :  { %7376 = vmatmul.mubr.msk.f32.gmra.mrb[84].mxu0 %vm76_vm0, %v4670_v15  ;;  %v7658_v15 = vpack.c.bf16 %v1557_v11, %v1556_v10 }
 0x1b3   :  { %7985 = vmatpush3.bf16.msra.mxu0 %v8196_v6  ;;  %7378 = vmatprep.mubr.msk.f32.mxu0 %vm76_vm0, %v4671_v3  ;;  %v4672_v6 = vld [vmem:[%s9717_s0 + $0x2a8] sm:$0xff] }
 0x1b4   :  { %7492 = vmatprep.subr.msk.mxu0 %vm125_vm1, %v8205_v7 }
 0x1b6   :  { %7379 = vmatmul.mubr.msk.f32.gmra.mrb[86].mxu0 %vm76_vm0, %v4672_v6  ;;  %v1558_v6 = vld [vmem:[%s9718_s4 + $0x190] sm:$0xff] }
 0x1b7   :  { %7493 = vmatpush3.msk.msra.mxu0 %vm125_vm1, %v8205_v7  ;;  %7381 = vmatprep.mubr.msk.f32.mxu0 %vm76_vm0, %v4673_v16  ;;  %v4674_v7 = vld [vmem:[%s9717_s0 + $0x2b8] sm:$0xff] }
 0x1b8   :  { %v1559_v16 = vld [vmem:[%s9718_s4 + $0x198] sm:$0xff] }
 0x1ba   :  { %7382 = vmatmul.mubr.msk.f32.gmra.mrb[88].mxu0 %vm76_vm0, %v4674_v7 }
 0x1bb   :  { %7384 = vmatprep.mubr.msk.f32.mxu0 %vm76_vm0, %v4675_v17 }
 0x1be   :  { %7385 = vmatmul.mubr.msk.f32.gmra.mrb[90].mxu0 %vm76_vm0, %v4676_v18 }
 0x1bf   :  { %7387 = vmatprep.mubr.msk.f32.mxu0 %vm76_vm0, %v4677_v19  ;;  %v7662_v19 = vpack.c.bf16 %v1559_v16, %v1558_v6 }
 0x1c2   :  { %7388 = vmatmul.mubr.msk.f32.gmra.mrb[92].mxu0 %vm76_vm0, %v4678_v20 }
 0x1c3   :  { %7390 = vmatprep.mubr.msk.f32.mxu0 %vm76_vm0, %v4679_v21  ;;  %v1643_v21 = vld [vmem:[%s9718_s4 + $0x1a0] sm:$0xff] }
 0x1c6   :  { %7391 = vmatmul.mubr.msk.f32.gmra.mrb[94].mxu0 %vm76_vm0, %v4680_v22  ;;  %v1644_v22 = vld [vmem:[%s9718_s4 + $0x1a8] sm:$0xff] }
 0x1c7   :  { %7393 = vmatprep.mubr.msk.f32.mxu0 %vm76_vm0, %v4681_v23 }
 0x1ca   :  { %7394 = vmatmul.mubr.msk.f32.gmra.mrb[96].mxu0 %vm76_vm0, %v4682_v24 }
 0x1cb   :  { %7494 = vmatprep.mubr.msk.f32.mxu0 %vm76_vm0, %v5588_v25 }
 0x1ce   :  { %7495 = vmatmul.mubr.msk.f32.vlgmr.msra.gmra.mrb[98].mxu0 %vm76_vm0, %v5589_v26  ;;  %v7666_v26 = vpack.c.bf16 %v1644_v22, %v1643_v21 }
 0x1f7   :  { %v8805_v27 = vpop.f32.mrb[16].mxu0 }
 0x1f8   :  { %v8807_v28 = vpop.f32.mrb[17].mxu0 }
 0x201   :  { %v6886_v29 = vpop.f32.mrb[18].mxu0 }
 0x202   :  { %v1119_v30 = vadd.f32 %v6886_v29, %v8293_v34  ;;  %v1113_v31 = vpop.f32.mrb[19].mxu0 }
 0x203   :  { %v1114_v32 = vadd.f32 %v8293_v34, %v1113_v31  ;;  %v1646_v31 = vld [vmem:[%s9718_s4 + $0x1b8] sm:$0xff] }
 0x204   :  { %v1193_v38 = vmax.f32 %v1119_v30, 0.0  ;;  %v1645_v30 = vld [vmem:[%s9718_s4 + $0x1b0] sm:$0xff] }
 0x205   :  { %v1192_v36 = vmax.f32 %v1114_v32, 0.0  ;;  %v6889_v37 = vpop.f32.mrb[20].mxu0 }
 0x206   :  { %v1123_v39 = vpop.f32.mrb[21].mxu0  ;;  %v1129_v46 = vadd.f32 %v6889_v37, %v8293_v34 }
 0x207   :  { %6916 = vmatprep.mubr.msk.f32.mxu1 %vm298_vm2, %v1192_v36  ;;  %v1124_v41 = vadd.f32 %v8293_v34, %v1123_v39  ;;  %v7670_v36 = vpack.c.bf16 %v1646_v31, %v1645_v30  ;;  %v1731_v39 = vld [vmem:[%s9718_s4 + $0x1c8] sm:$0xff] }
 0x208   :  { %6917 = vmatmul.mubr.msk.f32.vlgmr.msra.gmra.mrb[0].mxu1 %vm298_vm2, %v1193_v38  ;;  %v1195_v54 = vmax.f32 %v1129_v46, 0.0  ;;  %v1730_v38 = vld [vmem:[%s9718_s4 + $0x1c0] sm:$0xff]  ;;  %v1733_v46 = vld [vmem:[%s9718_s4 + $0x1d8] sm:$0xff] }
 0x209   :  { %7637 = vmatpush3.bf16.msra.mxu1 %v8646_v55  ;;  %v1194_v44 = vmax.f32 %v1124_v41, 0.0  ;;  %v6892_v45 = vpop.f32.mrb[22].mxu0  ;;  %v7646_v55 = vpack.c.bf16 %v1385_v51, %v1384_v50  ;;  %v7674_v43 = vpack.c.bf16 %v1731_v39, %v1730_v38 }
 0x20a   :  { %7639 = vmatprep.subr.bf16.mxu1 %v7638_v40  ;;  %v1133_v48 = vpop.f32.mrb[23].mxu0  ;;  %v1139_v61 = vadd.f32 %v6892_v45, %v8293_v34  ;;  %v1732_v45 = vld [vmem:[%s9718_s4 + $0x1d0] sm:$0xff] }
 0x20b   :  { %6927 = vmatprep.mubr.msk.f32.mxu1 %vm298_vm2, %v1194_v44  ;;  %v1134_v49 = vadd.f32 %v8293_v34, %v1133_v48  ;;  %v7678_v50 = vpack.c.bf16 %v1733_v46, %v1732_v45 }
 0x20c   :  { %v1197_v5 = vmax.f32 %v1139_v61, 0.0 }
 0x20d   :  { %7641 = vmatpush3.bf16.msra.mxu1 %v7638_v40  ;;  %v1196_v52 = vmax.f32 %v1134_v49, 0.0  ;;  %v6895_v53 = vpop.f32.mrb[24].mxu0 }
 0x20e   :  { %7643 = vmatprep.subr.bf16.mxu1 %v7642_v47  ;;  %v1143_v56 = vpop.f32.mrb[25].mxu0  ;;  %v1149_v14 = vadd.f32 %v6895_v53, %v8293_v34  ;;  %v1818_v53 = vld [vmem:[%s9718_s4 + $0x1e8] sm:$0xff] }
 0x20f   :  { %v1144_v59 = vadd.f32 %v8293_v34, %v1143_v56 }
 0x210   :  { %6928 = vmatmul.mubr.msk.f32.vlgmr.msra.gmra.mrb[0].mxu1 %vm298_vm2, %v1195_v54  ;;  %v1199_v18 = vmax.f32 %v1149_v14, 0.0 }
 0x211   :  { %7645 = vmatpush3.bf16.msra.mxu1 %v7642_v47  ;;  %6938 = vmatprep.mubr.msk.f32.mxu1 %vm298_vm2, %v1196_v52  ;;  %v6898_v60 = vpop.f32.mrb[26].mxu0  ;;  %v1198_v2 = vmax.f32 %v1144_v59, 0.0  ;;  %v1817_v52 = vld [vmem:[%s9718_s4 + $0x1e0] sm:$0xff]  ;;  %v1819_v59 = vld [vmem:[%s9718_s4 + $0x1f0] sm:$0xff] }
 0x212   :  { %7647 = vmatprep.subr.bf16.mxu1 %v7646_v55  ;;  %v1153_v63 = vpop.f32.mrb[27].mxu0  ;;  %v1159_v25 = vadd.f32 %v6898_v60, %v8293_v34  ;;  %v7682_v57 = vpack.c.bf16 %v1818_v53, %v1817_v52  ;;  %v1820_v60 = vld [vmem:[%s9718_s4 + $0x1f8] sm:$0xff] }
 0x213   :  { %v1154_v12 = vadd.f32 %v8293_v34, %v1153_v63  ;;  %v7686_v0 = vpack.c.bf16 %v1820_v60, %v1819_v59  ;;  %v2392_v59 = vld [vmem:[%s9718_s4 + $0x270] sm:$0xff]  ;;  %v2393_v60 = vld [vmem:[%s9718_s4 + $0x278] sm:$0xff] }
 0x214   :  { %v1201_v35 = vmax.f32 %v1159_v25, 0.0  ;;  %v2219_v25 = vld [vmem:[%s9718_s4 + $0x238] sm:$0xff] }
 0x215   :  { %7649 = vmatpush3.bf16.msra.mxu1 %v7646_v55  ;;  %v6901_v4 = vpop.f32.mrb[28].mxu0  ;;  %v1200_v7 = vmax.f32 %v1154_v12, 0.0  ;;  %v2131_v12 = vld [vmem:[%s9718_s4 + $0x210] sm:$0xff] }
 0x216   :  { %7651 = vmatprep.subr.bf16.mxu1 %v7650_v62  ;;  %v1163_v9 = vpop.f32.mrb[29].mxu0  ;;  %v1169_v42 = vadd.f32 %v6901_v4, %v8293_v34  ;;  %v2130_v4 = vld [vmem:[%s9718_s4 + $0x208] sm:$0xff] }
 0x217   :  { %v1164_v23 = vadd.f32 %v8293_v34, %v1163_v9 }
 0x218   :  { %6939 = vmatmul.mubr.msk.f32.vlgmr.msra.gmra.mrb[0].mxu1 %vm298_vm2, %v1197_v5  ;;  %v1203_v49 = vmax.f32 %v1169_v42, 0.0  ;;  %v2305_v42 = vld [vmem:[%s9718_s4 + $0x250] sm:$0xff] }
 0x219   :  { %7653 = vmatpush3.bf16.msra.mxu1 %v7650_v62  ;;  %6949 = vmatprep.mubr.msk.f32.mxu1 %vm298_vm2, %v1198_v2  ;;  %v6904_v13 = vpop.f32.mrb[30].mxu0  ;;  %v1202_v32 = vmax.f32 %v1164_v23, 0.0  ;;  %v2129_v2 = vld [vmem:[%s9718_s4 + $0x200] sm:$0xff]  ;;  %v2218_v23 = vld [vmem:[%s9718_s4 + $0x230] sm:$0xff] }
 0x21a   :  { %7655 = vmatprep.subr.bf16.mxu1 %v7654_v8  ;;  %v1173_v3 = vpop.f32.mrb[31].mxu0  ;;  %v1179_v56 = vadd.f32 %v6904_v13, %v8293_v34  ;;  %v7698_v10 = vpack.c.bf16 %v2130_v4, %v2129_v2  ;;  %v2132_v13 = vld [vmem:[%s9718_s4 + $0x218] sm:$0xff]  ;;  %v7710_v31 = vpack.c.bf16 %v2219_v25, %v2218_v23  ;;  %v2477_v2 = vld [vmem:[%s9718_s4 + $0x280] sm:$0xff]  ;;  %v2478_v4 = vld [vmem:[%s9718_s4 + $0x288] sm:$0xff] }
 0x21b   :  { %v1174_v40 = vadd.f32 %v8293_v34, %v1173_v3  ;;  %v7702_v6 = vpack.c.bf16 %v2132_v13, %v2131_v12  ;;  %v7730_v12 = vpack.c.bf16 %v2478_v4, %v2477_v2 }
 0x21c   :  { %v1205_v63 = vmax.f32 %v1179_v56, 0.0 }
 0x21d   :  { %7657 = vmatpush3.bf16.msra.mxu1 %v7654_v8  ;;  %v8868_v17 = vpop.f32.mrb[32].mxu0  ;;  %v1204_v47 = vmax.f32 %v1174_v40, 0.0 }
 0x21e   :  { %7659 = vmatprep.subr.bf16.mxu1 %v7658_v15  ;;  %v1183_v20 = vpop.f32.mrb[33].mxu0  ;;  %v1189_v9 = vadd.f32 %v8868_v17, %v8293_v34  ;;  %v2217_v17 = vld [vmem:[%s9718_s4 + $0x228] sm:$0xff] }
 0x21f   :  { %v1184_v54 = vadd.f32 %v8293_v34, %v1183_v20 }
 0x220   :  { %6950 = vmatmul.mubr.msk.f32.vlgmr.msra.gmra.mrb[0].mxu1 %vm298_vm2, %v1199_v18  ;;  %v1207_v3 = vmax.f32 %v1189_v9, 0.0 }
 0x221   :  { %7661 = vmatpush3.bf16.msra.mxu1 %v7658_v15  ;;  %6960 = vmatprep.mubr.msk.f32.mxu1 %vm298_vm2, %v1200_v7  ;;  %v8879_v24 = vpop.f32.mrb[34].mxu0  ;;  %v1206_v61 = vmax.f32 %v1184_v54, 0.0  ;;  %v2216_v7 = vld [vmem:[%s9718_s4 + $0x220] sm:$0xff] }
 0x222   :  { %7663 = vmatprep.subr.bf16.mxu1 %v7662_v19  ;;  %v2034_v29 = vpop.f32.mrb[35].mxu0  ;;  %v2040_v20 = vadd.f32 %v8879_v24, %v8293_v34  ;;  %v7706_v21 = vpack.c.bf16 %v2217_v17, %v2216_v7  ;;  %v2303_v24 = vld [vmem:[%s9718_s4 + $0x240] sm:$0xff] }
 0x223   :  { %v2035_v5 = vadd.f32 %v8293_v34, %v2034_v29 }
 0x224   :  { %v2114_v30 = vmax.f32 %v2040_v20, 0.0  ;;  %v2565_v20 = vld [vmem:[%s9718_s4 + $0x2a8] sm:$0xff] }
 0x225   :  { %7665 = vmatpush3.bf16.msra.mxu1 %v7662_v19  ;;  %v8888_v33 = vpop.f32.mrb[36].mxu0  ;;  %v2113_v14 = vmax.f32 %v2035_v5, 0.0 }
 0x226   :  { %7667 = vmatprep.subr.bf16.mxu1 %v7666_v26  ;;  %v8890_v37 = vpop.f32.mrb[37].mxu0 }
 0x227   :  { %v2045_v18 = vadd.f32 %v8293_v34, %v8890_v37 }
 0x228   :  { %6961 = vmatmul.mubr.msk.f32.vlgmr.msra.gmra.mrb[0].mxu1 %vm298_vm2, %v1201_v35  ;;  %v9002_v35 = vld [vmem:[%s9719_s3] ss:$0 sm:$0xff] }
 0x229   :  { %7669 = vmatpush3.bf16.msra.mxu1 %v7666_v26  ;;  %6971 = vmatprep.mubr.msk.f32.mxu1 %vm298_vm2, %v1202_v32  ;;  %v8901_v41 = vpop.f32.mrb[38].mxu0  ;;  %v2115_v26 = vmax.f32 %v2045_v18, 0.0  ;;  %v2304_v32 = vld [vmem:[%s9718_s4 + $0x248] sm:$0xff]  ;;  %v2050_v38 = vadd.f32 %v9002_v35, %v8888_v33  ;;  %v2564_v18 = vld [vmem:[%s9718_s4 + $0x2a0] sm:$0xff] }
 0x22a   :  { %7671 = vmatprep.subr.bf16.mxu1 %v7670_v36  ;;  %v8904_v44 = vpop.f32.mrb[39].mxu0  ;;  %v7714_v39 = vpack.c.bf16 %v2304_v32, %v2303_v24  ;;  %v2060_v54 = vadd.f32 %v9002_v35, %v8901_v41  ;;  %v2567_v24 = vld [vmem:[%s9718_s4 + $0x2b8] sm:$0xff] }
 0x22b   :  { %v2116_v46 = vmax.f32 %v2050_v38, 0.0 }
 0x22d   :  { %7673 = vmatpush3.bf16.msra.mxu1 %v7670_v36  ;;  %v8912_v48 = vpop.f32.mrb[40].mxu0  ;;  %v2055_v36 = vadd.f32 %v9002_v35, %v8904_v44 }
 0x22e   :  { %7675 = vmatprep.subr.bf16.mxu1 %v7674_v43  ;;  %v8914_v51 = vpop.f32.mrb[41].mxu0 }
 0x22f   :  { %v2117_v45 = vmax.f32 %v2055_v36, 0.0  ;;  %v2065_v52 = vadd.f32 %v9002_v35, %v8914_v51 }
 0x230   :  { %6972 = vmatmul.mubr.msk.f32.vlgmr.msra.gmra.mrb[0].mxu1 %vm298_vm2, %v1203_v49  ;;  %v2390_v49 = vld [vmem:[%s9718_s4 + $0x260] sm:$0xff] }
 0x231   :  { %7677 = vmatpush3.bf16.msra.mxu1 %v7674_v43  ;;  %6982 = vmatprep.mubr.msk.f32.mxu1 %vm298_vm2, %v1204_v47  ;;  %v8925_v55 = vpop.f32.mrb[42].mxu0  ;;  %v2306_v43 = vld [vmem:[%s9718_s4 + $0x258] sm:$0xff] }
 0x232   :  { %7679 = vmatprep.subr.bf16.mxu1 %v7678_v50  ;;  %v8928_v58 = vpop.f32.mrb[43].mxu0  ;;  %v7718_v47 = vpack.c.bf16 %v2306_v43, %v2305_v42  ;;  %v2080_v25 = vadd.f32 %v9002_v35, %v8925_v55  ;;  %v2652_v42 = vld [vmem:[%s9718_s4 + $0x2c8] sm:$0xff] }
 0x233   :  { %v2075_v5 = vadd.f32 %v9002_v35, %v8928_v58 }
 0x234   :  { %v2122_v36 = vmax.f32 %v2080_v25, 0.0 }
 0x235   :  { %7681 = vmatpush3.bf16.msra.mxu1 %v7678_v50  ;;  %v8936_v62 = vpop.f32.mrb[44].mxu0  ;;  %v2391_v50 = vld [vmem:[%s9718_s4 + $0x268] sm:$0xff] }
 0x236   :  { %7683 = vmatprep.subr.bf16.mxu1 %v7682_v57  ;;  %v8938_v1 = vpop.f32.mrb[45].mxu0  ;;  %v7722_v56 = vpack.c.bf16 %v2391_v50, %v2390_v49  ;;  %v2653_v50 = vld [vmem:[%s9718_s4 + $0x2d0] sm:$0xff] }
 0x238   :  { %6983 = vmatmul.mubr.msk.f32.vlgmr.msra.gmra.mrb[0].mxu1 %vm298_vm2, %v1205_v63  ;;  %v2118_v63 = vmax.f32 %v2060_v54, 0.0 }
 0x239   :  { %7685 = vmatpush3.bf16.msra.mxu1 %v7682_v57  ;;  %6993 = vmatprep.mubr.msk.f32.mxu1 %vm298_vm2, %v1206_v61  ;;  %v8949_v8 = vpop.f32.mrb[46].mxu0  ;;  %v2119_v61 = vmax.f32 %v2065_v52, 0.0  ;;  %v2654_v52 = vld [vmem:[%s9718_s4 + $0x2d8] sm:$0xff] }
 0x23a   :  { %7687 = vmatprep.subr.bf16.mxu1 %v7686_v0  ;;  %v8953_v11 = vpop.f32.mrb[47].mxu0  ;;  %v2100_v2 = vadd.f32 %v9002_v35, %v8949_v8 }
 0x23b   :  { %v2095_v43 = vadd.f32 %v9002_v35, %v8953_v11 }
 0x23d   :  { %7689 = vmatpush3.bf16.msra.mxu1 %v7686_v0  ;;  %v8961_v15 = vpop.f32.mrb[48].mxu0  ;;  %v7726_v0 = vpack.c.bf16 %v2393_v60, %v2392_v59  ;;  %v2125_v54 = vmax.f32 %v2095_v43, 0.0  ;;  %v7750_v59 = vpack.c.bf16 %v2654_v52, %v2653_v50  ;;  %v2738_v60 = vld [vmem:[%s9718_s4 + $0x2e0] sm:$0xff] }
 0x23e   :  { %7699 = vmatprep.subr.bf16.mxu1 %v7698_v10  ;;  %v8963_v16 = vpop.f32.mrb[49].mxu0 }
 0x240   :  { %6994 = vmatmul.mubr.msk.f32.vlgmr.msra.gmra.mrb[0].mxu1 %vm298_vm2, %v1207_v3  ;;  %v2480_v3 = vld [vmem:[%s9718_s4 + $0x298] sm:$0xff] }
 0x241   :  { %7701 = vmatpush3.bf16.msra.mxu1 %v7698_v10  ;;  %7038 = vmatprep.mubr.msk.f32.mxu1 %vm298_vm2, %v2113_v14  ;;  %v8975_v19 = vpop.f32.mrb[50].mxu0  ;;  %v2070_v10 = vadd.f32 %v9002_v35, %v8912_v48  ;;  %v2479_v14 = vld [vmem:[%s9718_s4 + $0x290] sm:$0xff] }
 0x242   :  { %7703 = vmatprep.subr.bf16.mxu1 %v7702_v6  ;;  %v8979_v22 = vpop.f32.mrb[51].mxu0  ;;  %v7734_v17 = vpack.c.bf16 %v2480_v3, %v2479_v14  ;;  %v2126_v3 = vmax.f32 %v2100_v2, 0.0 }
 0x243   :  { %v2120_v7 = vmax.f32 %v2070_v10, 0.0  ;;  %v2740_v10 = vld [vmem:[%s9718_s4 + $0x2f0] sm:$0xff] }
 0x245   :  { %7705 = vmatpush3.bf16.msra.mxu1 %v7702_v6  ;;  %v8987_v29 = vpop.f32.mrb[52].mxu0  ;;  %v2121_v6 = vmax.f32 %v2075_v5, 0.0 }
 0x246   :  { %7707 = vmatprep.subr.bf16.mxu1 %v7706_v21  ;;  %v8989_v34 = vpop.f32.mrb[53].mxu0 }
 0x247   :  { %v2966_v43 = vadd.f32 %v9002_v35, %v8989_v34 }
 0x248   :  { %7039 = vmatmul.mubr.msk.f32.vlgmr.msra.gmra.mrb[0].mxu1 %vm298_vm2, %v2114_v30 }
 0x249   :  { %7709 = vmatpush3.bf16.msra.mxu1 %v7706_v21  ;;  %7049 = vmatprep.mubr.msk.f32.mxu1 %vm298_vm2, %v2115_v26  ;;  %v9006_v37 = vpop.f32.mrb[54].mxu0  ;;  %v2085_v21 = vadd.f32 %v9002_v35, %v8938_v1  ;;  %v7738_v26 = vpack.c.bf16 %v2565_v20, %v2564_v18  ;;  %v2956_v18 = vadd.f32 %v9002_v35, %v8979_v22 }
 0x24a   :  { %7711 = vmatprep.subr.bf16.mxu1 %v7710_v31  ;;  %v9010_v40 = vpop.f32.mrb[55].mxu0 }
 0x24b   :  { %v2123_v32 = vmax.f32 %v2085_v21, 0.0  ;;  %v2110_v21 = vadd.f32 %v9002_v35, %v8961_v15  ;;  %v2976_v2 = vadd.f32 %v9002_v35, %v9010_v40 }
 0x24d   :  { %7713 = vmatpush3.bf16.msra.mxu1 %v7710_v31  ;;  %v9018_v44 = vpop.f32.mrb[56].mxu0  ;;  %v2566_v31 = vld [vmem:[%s9718_s4 + $0x2b0] sm:$0xff] }
 0x24e   :  { %7715 = vmatprep.subr.bf16.mxu1 %v7714_v39  ;;  %v9020_v33 = vpop.f32.mrb[57].mxu0  ;;  %v7742_v38 = vpack.c.bf16 %v2567_v24, %v2566_v31  ;;  %v3052_v31 = vld [vmem:[%s9718_s4 + $0x310] sm:$0xff]  ;;  %v3053_v24 = vld [vmem:[%s9718_s4 + $0x318] sm:$0xff] }
 0x250   :  { %7050 = vmatmul.mubr.msk.f32.vlgmr.msra.gmra.mrb[0].mxu1 %vm298_vm2, %v2116_v46  ;;  %v2090_v46 = vadd.f32 %v9002_v35, %v8936_v62 }
 0x251   :  { %7717 = vmatpush3.bf16.msra.mxu1 %v7714_v39  ;;  %7060 = vmatprep.mubr.msk.f32.mxu1 %vm298_vm2, %v2117_v45  ;;  %v9032_v53 = vpop.f32.mrb[58].mxu0  ;;  %v2651_v39 = vld [vmem:[%s9718_s4 + $0x2c0] sm:$0xff] }
 0x252   :  { %7719 = vmatprep.subr.bf16.mxu1 %v7718_v47  ;;  %v9036_v57 = vpop.f32.mrb[59].mxu0 }
 0x255   :  { %7721 = vmatpush3.bf16.msra.mxu1 %v7718_v47  ;;  %v9044_v51 = vpop.f32.mrb[60].mxu0  ;;  %v7746_v47 = vpack.c.bf16 %v2652_v42, %v2651_v39  ;;  %v3137_v39 = vld [vmem:[%s9718_s4 + $0x320] sm:$0xff]  ;;  %v3138_v42 = vld [vmem:[%s9718_s4 + $0x328] sm:$0xff] }
 0x256   :  { %7723 = vmatprep.subr.bf16.mxu1 %v7722_v56  ;;  %v9046_v41 = vpop.f32.mrb[61].mxu0  ;;  %v7778_v50 = vpack.c.bf16 %v3138_v42, %v3137_v39  ;;  %v3398_v42 = vld [vmem:[%s9718_s4 + $0x380] sm:$0xff] }
 0x258   :  { %7061 = vmatmul.mubr.msk.f32.vlgmr.msra.gmra.mrb[0].mxu1 %vm298_vm2, %v2118_v63  ;;  %v2105_v63 = vadd.f32 %v9002_v35, %v8963_v16 }
 0x259   :  { %7725 = vmatpush3.bf16.msra.mxu1 %v7722_v56  ;;  %7071 = vmatprep.mubr.msk.f32.mxu1 %vm298_vm2, %v2119_v61  ;;  %v9058_v9 = vpop.f32.mrb[62].mxu0  ;;  %v2124_v56 = vmax.f32 %v2090_v46, 0.0  ;;  %v2739_v61 = vld [vmem:[%s9718_s4 + $0x2e8] sm:$0xff] }
 0x25a   :  { %7727 = vmatprep.subr.bf16.mxu1 %v7726_v0  ;;  %v9062_v13 = vpop.f32.mrb[63].mxu0  ;;  %v7754_v4 = vpack.c.bf16 %v2739_v61, %v2738_v60  ;;  %v2127_v14 = vmax.f32 %v2105_v63, 0.0  ;;  %v3225_v61 = vld [vmem:[%s9718_s4 + $0x348] sm:$0xff] }
 0x25d   :  { %7729 = vmatpush3.bf16.msra.mxu1 %v7726_v0  ;;  %v9070_v58 = vpop.f32.mrb[64].mxu0 }
 0x25e   :  { %7731 = vmatprep.subr.bf16.mxu1 %v7730_v12  ;;  %v9072_v48 = vpop.f32.mrb[65].mxu0 }
 0x260   :  { %7072 = vmatmul.mubr.msk.f32.vlgmr.msra.gmra.mrb[0].mxu1 %vm298_vm2, %v2120_v7  ;;  %v3050_v7 = vld [vmem:[%s9718_s4 + $0x300] sm:$0xff] }
 0x261   :  { %7733 = vmatpush3.bf16.msra.mxu1 %v7730_v12  ;;  %7082 = vmatprep.mubr.msk.f32.mxu1 %vm298_vm2, %v2121_v6  ;;  %v9084_v23 = vpop.f32.mrb[66].mxu0  ;;  %v2741_v12 = vld [vmem:[%s9718_s4 + $0x2f8] sm:$0xff] }
 0x262   :  { %7735 = vmatprep.subr.bf16.mxu1 %v7734_v17  ;;  %v9088_v30 = vpop.f32.mrb[67].mxu0  ;;  %v7758_v6 = vpack.c.bf16 %v2741_v12, %v2740_v10  ;;  %v2971_v10 = vadd.f32 %v9002_v35, %v8987_v29  ;;  %v3312_v29 = vld [vmem:[%s9718_s4 + $0x368] sm:$0xff] }
 0x265   :  { %7737 = vmatpush3.bf16.msra.mxu1 %v7734_v17  ;;  %v9096_v1 = vpop.f32.mrb[68].mxu0  ;;  %v3051_v17 = vld [vmem:[%s9718_s4 + $0x308] sm:$0xff] }
 0x266   :  { %7739 = vmatprep.subr.bf16.mxu1 %v7738_v26  ;;  %v9098_v55 = vpop.f32.mrb[69].mxu0  ;;  %v7770_v25 = vpack.c.bf16 %v3051_v17, %v3050_v7  ;;  %v3037_v7 = vmax.f32 %v2971_v10, 0.0  ;;  %v3311_v17 = vld [vmem:[%s9718_s4 + $0x360] sm:$0xff]  ;;  %v3006_v10 = vadd.f32 %v9002_v35, %v9046_v41 }
 0x268   :  { %7083 = vmatmul.mubr.msk.f32.vlgmr.msra.gmra.mrb[0].mxu1 %vm298_vm2, %v2122_v36  ;;  %v2128_v36 = vmax.f32 %v2110_v21, 0.0  ;;  %v2986_v21 = vadd.f32 %v9002_v35, %v9020_v33 }
 0x269   :  { %7741 = vmatpush3.bf16.msra.mxu1 %v7738_v26  ;;  %7093 = vmatprep.mubr.msk.f32.mxu1 %vm298_vm2, %v2123_v32  ;;  %v9110_v45 = vpop.f32.mrb[70].mxu0  ;;  %v3034_v32 = vmax.f32 %v2956_v18, 0.0 }
 0x26a   :  { %7743 = vmatprep.subr.bf16.mxu1 %v7742_v38  ;;  %v9114_v49 = vpop.f32.mrb[71].mxu0 }
 0x26d   :  { %7745 = vmatpush3.bf16.msra.mxu1 %v7742_v38  ;;  %v9122_v11 = vpop.f32.mrb[72].mxu0  ;;  %v7774_v38 = vpack.c.bf16 %v3053_v24, %v3052_v31  ;;  %v2981_v31 = vadd.f32 %v9002_v35, %v9006_v37  ;;  %v7794_v24 = vpack.c.bf16 %v3312_v29, %v3311_v17  ;;  %v3399_v37 = vld [vmem:[%s9718_s4 + $0x388] sm:$0xff]  ;;  %v3572_v29 = vld [vmem:[%s9718_s4 + $0x3c0] sm:$0xff] }
 0x26e   :  { %7747 = vmatprep.subr.bf16.mxu1 %v7746_v47  ;;  %v9124_v62 = vpop.f32.mrb[73].mxu0 }
 0x26f   :  { %v3039_v39 = vmax.f32 %v2981_v31, 0.0  ;;  %v3016_v31 = vadd.f32 %v9002_v35, %v9062_v13 }
 0x270   :  { %7094 = vmatmul.mubr.msk.f32.vlgmr.msra.gmra.mrb[0].mxu1 %vm298_vm2, %v2124_v56  ;;  %v3140_v56 = vld [vmem:[%s9718_s4 + $0x338] sm:$0xff] }
 0x271   :  { %7749 = vmatpush3.bf16.msra.mxu1 %v7746_v47  ;;  %7104 = vmatprep.mubr.msk.f32.mxu1 %vm298_vm2, %v2125_v54  ;;  %v9136_v0 = vpop.f32.mrb[74].mxu0  ;;  %v2961_v47 = vadd.f32 %v9002_v35, %v8975_v19  ;;  %v3139_v54 = vld [vmem:[%s9718_s4 + $0x330] sm:$0xff]  ;;  %v3224_v19 = vld [vmem:[%s9718_s4 + $0x340] sm:$0xff] }
 0x272   :  { %7751 = vmatprep.subr.bf16.mxu1 %v7750_v59  ;;  %v9140_v5 = vpop.f32.mrb[75].mxu0  ;;  %v7782_v60 = vpack.c.bf16 %v3140_v56, %v3139_v54  ;;  %v7786_v12 = vpack.c.bf16 %v3225_v61, %v3224_v19  ;;  %v2991_v54 = vadd.f32 %v9002_v35, %v9018_v44  ;;  %v7802_v56 = vpack.c.bf16 %v3399_v37, %v3398_v42  ;;  %v3485_v61 = vld [vmem:[%s9718_s4 + $0x3a0] sm:$0xff]  ;;  %v3486_v44 = vld [vmem:[%s9718_s4 + $0x3a8] sm:$0xff] }
 0x273   :  { %v3035_v34 = vmax.f32 %v2961_v47, 0.0  ;;  %v2996_v47 = vadd.f32 %v9002_v35, %v9036_v57  ;;  %v3659_v37 = vld [vmem:[%s9718_s4 + $0x3e0] sm:$0xff] }
 0x274   :  { %v3041_v19 = vmax.f32 %v2991_v54, 0.0  ;;  %v3026_v54 = vadd.f32 %v9002_v35, %v9072_v48  ;;  %v5674_v48 = vld [vmem:[%s9718_s4 + $0x608] sm:$0xff] }
 0x275   :  { %7753 = vmatpush3.bf16.msra.mxu1 %v7750_v59  ;;  %v9148_v16 = vpop.f32.mrb[76].mxu0  ;;  %v3036_v59 = vmax.f32 %v2966_v43, 0.0 }
 0x276   :  { %7755 = vmatprep.subr.bf16.mxu1 %v7754_v4  ;;  %v9150_v8 = vpop.f32.mrb[77].mxu0 }
 0x278   :  { %7105 = vmatmul.mubr.msk.f32.vlgmr.msra.gmra.mrb[0].mxu1 %vm298_vm2, %v2126_v3  ;;  %v3227_v3 = vld [vmem:[%s9718_s4 + $0x358] sm:$0xff] }
 0x279   :  { %7757 = vmatpush3.bf16.msra.mxu1 %v7754_v4  ;;  %7115 = vmatprep.mubr.msk.f32.mxu1 %vm298_vm2, %v2127_v14  ;;  %v9162_v20 = vpop.f32.mrb[78].mxu0  ;;  %v3226_v14 = vld [vmem:[%s9718_s4 + $0x350] sm:$0xff] }
 0x27a   :  { %7759 = vmatprep.subr.bf16.mxu1 %v7758_v6  ;;  %v9166_v26 = vpop.f32.mrb[79].mxu0  ;;  %v7790_v40 = vpack.c.bf16 %v3227_v3, %v3226_v14  ;;  %v3001_v14 = vadd.f32 %v9002_v35, %v9032_v53  ;;  %v7810_v3 = vpack.c.bf16 %v3486_v44, %v3485_v61  ;;  %v3573_v53 = vld [vmem:[%s9718_s4 + $0x3c8] sm:$0xff] }
 0x27c   :  { %v3043_v17 = vmax.f32 %v3001_v14, 0.0 }
 0x27d   :  { %7761 = vmatpush3.bf16.msra.mxu1 %v7758_v6  ;;  %v9174_v22 = vpop.f32.mrb[80].mxu0  ;;  %v3038_v6 = vmax.f32 %v2976_v2, 0.0 }
 0x27e   :  { %7771 = vmatprep.subr.bf16.mxu1 %v7770_v25  ;;  %v9176_v15 = vpop.f32.mrb[81].mxu0 }
 0x280   :  { %7116 = vmatmul.mubr.msk.f32.vlgmr.msra.gmra.mrb[0].mxu1 %vm298_vm2, %v2128_v36  ;;  %v3314_v36 = vld [vmem:[%s9718_s4 + $0x378] sm:$0xff] }
 0x281   :  { %7773 = vmatpush3.bf16.msra.mxu1 %v7770_v25  ;;  %7160 = vmatprep.mubr.msk.f32.mxu1 %vm298_vm2, %v3034_v32  ;;  %v9188_v46 = vpop.f32.mrb[82].mxu0  ;;  %v3313_v32 = vld [vmem:[%s9718_s4 + $0x370] sm:$0xff] }
 0x282   :  { %7775 = vmatprep.subr.bf16.mxu1 %v7774_v38  ;;  %v9192_v52 = vpop.f32.mrb[83].mxu0  ;;  %v7798_v33 = vpack.c.bf16 %v3314_v36, %v3313_v32  ;;  %v3011_v32 = vadd.f32 %v9002_v35, %v9044_v51  ;;  %v7818_v36 = vpack.c.bf16 %v3573_v53, %v3572_v29  ;;  %v3660_v51 = vld [vmem:[%s9718_s4 + $0x3e8] sm:$0xff]  ;;  %v3877_v29 = vadd.f32 %v9002_v35, %v9088_v30 }
 0x284   :  { %v3045_v42 = vmax.f32 %v3011_v32, 0.0 }
 0x285   :  { %7777 = vmatpush3.bf16.msra.mxu1 %v7774_v38  ;;  %v9207_v63 = vpop.f32.mrb[84].mxu0  ;;  %v3040_v38 = vmax.f32 %v2986_v21, 0.0 }
 0x286   :  { %7779 = vmatprep.subr.bf16.mxu1 %v7778_v50  ;;  %v9212_v4 = vpop.f32.mrb[85].mxu0 }
 0x288   :  { %7161 = vmatmul.mubr.msk.f32.vlgmr.msra.gmra.mrb[0].mxu1 %vm298_vm2, %v3035_v34  ;;  %v3401_v34 = vld [vmem:[%s9718_s4 + $0x398] sm:$0xff] }
 0x289   :  { %7781 = vmatpush3.bf16.msra.mxu1 %v7778_v50  ;;  %7171 = vmatprep.mubr.msk.f32.mxu1 %vm298_vm2, %v3036_v59  ;;  %v9229_v18 = vpop.f32.mrb[86].mxu0  ;;  %v3400_v59 = vld [vmem:[%s9718_s4 + $0x390] sm:$0xff] }
 0x28a   :  { %7783 = vmatprep.subr.bf16.mxu1 %v7782_v60  ;;  %v9234_v25 = vpop.f32.mrb[87].mxu0  ;;  %v7806_v57 = vpack.c.bf16 %v3401_v34, %v3400_v59  ;;  %v3021_v59 = vadd.f32 %v9002_v35, %v9058_v9  ;;  %v7826_v34 = vpack.c.bf16 %v3660_v51, %v3659_v37  ;;  %v3048_v9 = vmax.f32 %v3026_v54, 0.0  ;;  %v4058_v54 = vld [vmem:[%s9718_s4 + $0x420] sm:$0xff] }
 0x28b   :  { %v3955_v37 = vmax.f32 %v3877_v29, 0.0 }
 0x28d   :  { %7785 = vmatpush3.bf16.msra.mxu1 %v7782_v60  ;;  %v9251_v43 = vpop.f32.mrb[88].mxu0  ;;  %v3042_v60 = vmax.f32 %v2996_v47, 0.0 }
 0x28e   :  { %7787 = vmatprep.subr.bf16.mxu1 %v7786_v12  ;;  %v9256_v50 = vpop.f32.mrb[89].mxu0 }
 0x290   :  { %7172 = vmatmul.mubr.msk.f32.vlgmr.msra.gmra.mrb[0].mxu1 %vm298_vm2, %v3037_v7  ;;  %v3488_v7 = vld [vmem:[%s9718_s4 + $0x3b8] sm:$0xff] }
 0x291   :  { %7789 = vmatpush3.bf16.msra.mxu1 %v7786_v12  ;;  %7182 = vmatprep.mubr.msk.f32.mxu1 %vm298_vm2, %v3038_v6  ;;  %v9273_v2 = vpop.f32.mrb[90].mxu0  ;;  %v3487_v6 = vld [vmem:[%s9718_s4 + $0x3b0] sm:$0xff] }
 0x292   :  { %7791 = vmatprep.subr.bf16.mxu1 %v7790_v40  ;;  %v9278_v12 = vpop.f32.mrb[91].mxu0  ;;  %v7814_v41 = vpack.c.bf16 %v3488_v7, %v3487_v6  ;;  %v3971_v6 = vld [vmem:[%s9718_s4 + $0x400] sm:$0xff]  ;;  %v3972_v7 = vld [vmem:[%s9718_s4 + $0x408] sm:$0xff] }
 0x295   :  { %7793 = vmatpush3.bf16.msra.mxu1 %v7790_v40  ;;  %v3044_v40 = vmax.f32 %v3006_v10, 0.0  ;;  %v9295_v21 = vpop.f32.mrb[92].mxu0  ;;  %v3047_v10 = vmax.f32 %v3021_v59, 0.0  ;;  %v4059_v59 = vld [vmem:[%s9718_s4 + $0x428] sm:$0xff] }
 0x296   :  { %7795 = vmatprep.subr.bf16.mxu1 %v7794_v24 }
 0x298   :  { %7183 = vmatmul.mubr.msk.f32.vlgmr.msra.gmra.mrb[0].mxu1 %vm298_vm2, %v3039_v39  ;;  %v3575_v39 = vld [vmem:[%s9718_s4 + $0x3d8] sm:$0xff] }
 0x299   :  { %7797 = vmatpush3.bf16.msra.mxu1 %v7794_v24  ;;  %7193 = vmatprep.mubr.msk.f32.mxu1 %vm298_vm2, %v3040_v38  ;;  %v9300_v24 = vpop.f32.mrb[93].mxu0  ;;  %v3574_v38 = vld [vmem:[%s9718_s4 + $0x3d0] sm:$0xff] }
 0x29a   :  { %7799 = vmatprep.subr.bf16.mxu1 %v7798_v33  ;;  %v7822_v13 = vpack.c.bf16 %v3575_v39, %v3574_v38  ;;  %v9317_v47 = vpop.f32.mrb[94].mxu0  ;;  %v7842_v38 = vpack.c.bf16 %v3972_v7, %v3971_v6  ;;  %v3892_v6 = vadd.f32 %v9002_v35, %v9096_v1  ;;  %v4233_v1 = vld [vmem:[%s9718_s4 + $0x468] sm:$0xff] }
 0x29c   :  { %v3958_v29 = vmax.f32 %v3892_v6, 0.0  ;;  %v3932_v6 = vadd.f32 %v9002_v35, %v9148_v16  ;;  %v4581_v16 = vld [vmem:[%s9718_s4 + $0x4e8] sm:$0xff] }
 0x29d   :  { %7801 = vmatpush3.bf16.msra.mxu1 %v7798_v33  ;;  %v3046_v33 = vmax.f32 %v3016_v31, 0.0 }
 0x29e   :  { %7803 = vmatprep.subr.bf16.mxu1 %v7802_v56 }
 0x2a0   :  { %7194 = vmatmul.mubr.msk.f32.vlgmr.msra.gmra.mrb[0].mxu1 %vm298_vm2, %v3041_v19  ;;  %v3662_v19 = vld [vmem:[%s9718_s4 + $0x3f8] sm:$0xff] }
 0x2a1   :  { %7805 = vmatpush3.bf16.msra.mxu1 %v7802_v56  ;;  %7204 = vmatprep.mubr.msk.f32.mxu1 %vm298_vm2, %v3042_v60  ;;  %v9322_v56 = vpop.f32.mrb[95].mxu0  ;;  %v3661_v60 = vld [vmem:[%s9718_s4 + $0x3f0] sm:$0xff] }
 0x2a2   :  { %7807 = vmatprep.subr.bf16.mxu1 %v7806_v57  ;;  %v9338_v61 = vpop.f32.mrb[96].mxu0  ;;  %v7830_v14 = vpack.c.bf16 %v3662_v19, %v3661_v60  ;;  %v3882_v60 = vadd.f32 %v9002_v35, %v9084_v23  ;;  %v7850_v19 = vpack.c.bf16 %v4059_v59, %v4058_v54  ;;  %v4146_v23 = vld [vmem:[%s9718_s4 + $0x448] sm:$0xff]  ;;  %v4322_v54 = vld [vmem:[%s9718_s4 + $0x498] sm:$0xff] }
 0x2a5   :  { %7809 = vmatpush3.bf16.msra.mxu1 %v7806_v57  ;;  %v5673_v57 = vld [vmem:[%s9718_s4 + $0x600] sm:$0xff] }
 0x2a6   :  { %7811 = vmatprep.subr.bf16.mxu1 %v7810_v3  ;;  %v7986_v44 = vpack.c.bf16 %v5674_v48, %v5673_v57  ;;  %v4060_v57 = vld [vmem:[%s9718_s4 + $0x430] sm:$0xff]  ;;  %v4061_v48 = vld [vmem:[%s9718_s4 + $0x438] sm:$0xff] }
 0x2a8   :  { %7205 = vmatmul.mubr.msk.f32.vlgmr.msra.gmra.mrb[0].mxu1 %vm298_vm2, %v3043_v17  ;;  %7987 = vmatprep.subr.bf16.mxu0 %v7986_v44  ;;  %v5675_v17 = vld [vmem:[%s9718_s4 + $0x610] sm:$0xff] }
 0x2a9   :  { %7813 = vmatpush3.bf16.msra.mxu1 %v7810_v3  ;;  %7215 = vmatprep.mubr.msk.f32.mxu1 %vm298_vm2, %v3044_v40  ;;  %v9340_v3 = vpop.f32.mrb[97].mxu0 }
 0x2aa   :  { %7815 = vmatprep.subr.bf16.mxu1 %v7814_v41  ;;  %v7496_v40 = vpop.f32.mrb[98].mxu0  ;;  %7989 = vmatpush3.bf16.msra.mxu0 %v7986_v44  ;;  %v3956_v44 = vmax.f32 %v3882_v60, 0.0 }
 0x2ab   :  { %v5668_v53 = vadd.f32 %v9002_v35, %v7496_v40  ;;  %v5662_v31 = vpop.f32.mrb[99].mxu0  ;;  %v4147_v40 = vld [vmem:[%s9718_s4 + $0x450] sm:$0xff] }
 0x2ac   :  { %v5663_v39 = vadd.f32 %v9002_v35, %v5662_v31  ;;  %v3907_v31 = vadd.f32 %v9002_v35, %v9124_v62  ;;  %v4319_v62 = vld [vmem:[%s9718_s4 + $0x480] sm:$0xff] }
 0x2ad   :  { %7817 = vmatpush3.bf16.msra.mxu1 %v7814_v41  ;;  %v5676_v41 = vld [vmem:[%s9718_s4 + $0x618] sm:$0xff]  ;;  %v5672_v30 = vmax.f32 %v5668_v53, 0.0 }
 0x2ae   :  { %7819 = vmatprep.subr.bf16.mxu1 %v7818_v36  ;;  %v7990_v32 = vpack.c.bf16 %v5676_v41, %v5675_v17  ;;  %v4148_v17 = vld [vmem:[%s9718_s4 + $0x458] sm:$0xff] }
 0x2af   :  { %v7862_v53 = vpack.c.bf16 %v4148_v17, %v4147_v40  ;;  %v4495_v40 = vld [vmem:[%s9718_s4 + $0x4d0] sm:$0xff]  ;;  %v4496_v17 = vld [vmem:[%s9718_s4 + $0x4d8] sm:$0xff] }
 0x2b0   :  { %7216 = vmatmul.mubr.msk.f32.vlgmr.msra.gmra.mrb[0].mxu1 %vm298_vm2, %v3045_v42  ;;  %v3974_v42 = vld [vmem:[%s9718_s4 + $0x418] sm:$0xff]  ;;  %7991 = vmatprep.subr.bf16.mxu0 %v7990_v32 }
 0x2b1   :  { %7821 = vmatpush3.bf16.msra.mxu1 %v7818_v36  ;;  %7226 = vmatprep.mubr.msk.f32.mxu1 %vm298_vm2, %v3046_v33  ;;  %v3031_v36 = vadd.f32 %v9002_v35, %v9070_v58  ;;  %v3973_v33 = vld [vmem:[%s9718_s4 + $0x410] sm:$0xff] }
 0x2b2   :  { %7823 = vmatprep.subr.bf16.mxu1 %v7822_v13  ;;  %7993 = vmatpush3.bf16.msra.mxu0 %v7990_v32  ;;  %v7846_v58 = vpack.c.bf16 %v3974_v42, %v3973_v33  ;;  %v3902_v32 = vadd.f32 %v9002_v35, %v9110_v45  ;;  %v3961_v33 = vmax.f32 %v3907_v31, 0.0  ;;  %v4320_v45 = vld [vmem:[%s9718_s4 + $0x488] sm:$0xff] }
 0x2b3   :  { %v3049_v51 = vmax.f32 %v3031_v36, 0.0 }
 0x2b4   :  { %v3960_v42 = vmax.f32 %v3902_v32, 0.0  ;;  %v4582_v32 = vld [vmem:[%s9718_s4 + $0x4f0] sm:$0xff] }
 0x2b5   :  { %7825 = vmatpush3.bf16.msra.mxu1 %v7822_v13  ;;  %v5671_v13 = vmax.f32 %v5663_v39, 0.0  ;;  %v4235_v39 = vld [vmem:[%s9718_s4 + $0x478] sm:$0xff] }
 0x2b6   :  { %7827 = vmatprep.subr.bf16.mxu1 %v7826_v34 }
 0x2b7   :  { %7505 = vmatprep.mubr.msk.f32.mxu0 %vm298_vm2, %v5671_v13  ;;  %v3917_v13 = vadd.f32 %v9002_v35, %v9140_v5  ;;  %v4406_v5 = vld [vmem:[%s9718_s4 + $0x4a0] sm:$0xff] }
 0x2b8   :  { %7227 = vmatmul.mubr.msk.f32.vlgmr.msra.gmra.mrb[0].mxu1 %vm298_vm2, %v3047_v10  ;;  %7506 = vmatmul.mubr.msk.f32.vlgmr.msra.gmra.mrb[100].mxu0 %vm298_vm2, %v5672_v30  ;;  %v7854_v10 = vpack.c.bf16 %v4061_v48, %v4060_v57  ;;  %v3922_v57 = vadd.f32 %v9002_v35, %v9136_v0  ;;  %v4494_v0 = vld [vmem:[%s9718_s4 + $0x4c8] sm:$0xff] }
 0x2b9   :  { %7829 = vmatpush3.bf16.msra.mxu1 %v7826_v34  ;;  %7237 = vmatprep.mubr.msk.f32.mxu1 %vm298_vm2, %v3048_v9  ;;  %v3887_v34 = vadd.f32 %v9002_v35, %v9098_v55  ;;  %v4145_v55 = vld [vmem:[%s9718_s4 + $0x440] sm:$0xff]  ;;  %v3963_v59 = vmax.f32 %v3917_v13, 0.0  ;;  %v4895_v13 = vld [vmem:[%s9718_s4 + $0x518] sm:$0xff] }
 0x2ba   :  { %7831 = vmatprep.subr.bf16.mxu1 %v7830_v14  ;;  %v7858_v7 = vpack.c.bf16 %v4146_v23, %v4145_v55  ;;  %v3964_v55 = vmax.f32 %v3922_v57, 0.0 }
 0x2bb   :  { %v3957_v9 = vmax.f32 %v3887_v34, 0.0 }
 0x2bd   :  { %7833 = vmatpush3.bf16.msra.mxu1 %v7830_v14  ;;  %v3897_v14 = vadd.f32 %v9002_v35, %v9114_v49  ;;  %v4232_v49 = vld [vmem:[%s9718_s4 + $0x460] sm:$0xff] }
 0x2be   :  { %7843 = vmatprep.subr.bf16.mxu1 %v7842_v38  ;;  %v7866_v36 = vpack.c.bf16 %v4233_v1, %v4232_v49  ;;  %v3947_v49 = vadd.f32 %v9002_v35, %v9176_v15  ;;  %v3942_v1 = vadd.f32 %v9002_v35, %v9162_v20  ;;  %v4892_v15 = vld [vmem:[%s9718_s4 + $0x500] sm:$0xff]  ;;  %v4893_v20 = vld [vmem:[%s9718_s4 + $0x508] sm:$0xff] }
 0x2bf   :  { %v3959_v41 = vmax.f32 %v3897_v14, 0.0  ;;  %v3937_v14 = vadd.f32 %v9002_v35, %v9166_v26  ;;  %v4580_v26 = vld [vmem:[%s9718_s4 + $0x4e0] sm:$0xff] }
 0x2c0   :  { %7238 = vmatmul.mubr.msk.f32.vlgmr.msra.gmra.mrb[0].mxu1 %vm298_vm2, %v3049_v51  ;;  %v7874_v51 = vpack.c.bf16 %v4320_v45, %v4319_v62  ;;  %v7898_v31 = vpack.c.bf16 %v4581_v16, %v4580_v26  ;;  %v7914_v62 = vpack.c.bf16 %v4893_v20, %v4892_v15  ;;  %v4894_v45 = vld [vmem:[%s9718_s4 + $0x510] sm:$0xff]  ;;  %v4838_v26 = vadd.f32 %v9002_v35, %v9278_v12  ;;  %v5327_v12 = vld [vmem:[%s9718_s4 + $0x5a0] sm:$0xff] }
 0x2c1   :  { %7845 = vmatpush3.bf16.msra.mxu1 %v7842_v38  ;;  %7282 = vmatprep.mubr.msk.f32.mxu1 %vm298_vm2, %v3955_v37  ;;  %v4234_v38 = vld [vmem:[%s9718_s4 + $0x470] sm:$0xff]  ;;  %v3912_v37 = vadd.f32 %v9002_v35, %v9122_v11  ;;  %v4407_v11 = vld [vmem:[%s9718_s4 + $0x4a8] sm:$0xff]  ;;  %v4833_v16 = vadd.f32 %v9002_v35, %v9251_v43 }
 0x2c2   :  { %7847 = vmatprep.subr.bf16.mxu1 %v7846_v58  ;;  %v7870_v30 = vpack.c.bf16 %v4235_v39, %v4234_v38  ;;  %v7882_v48 = vpack.c.bf16 %v4407_v11, %v4406_v5  ;;  %v3969_v38 = vmax.f32 %v3947_v49, 0.0  ;;  %v3968_v39 = vmax.f32 %v3942_v1, 0.0  ;;  %v4982_v5 = vld [vmem:[%s9718_s4 + $0x538] sm:$0xff]  ;;  %v5242_v1 = vld [vmem:[%s9718_s4 + $0x590] sm:$0xff]  ;;  %v5328_v43 = vld [vmem:[%s9718_s4 + $0x5a8] sm:$0xff] }
 0x2c3   :  { %v3962_v34 = vmax.f32 %v3912_v37, 0.0  ;;  %v7954_v15 = vpack.c.bf16 %v5328_v43, %v5327_v12  ;;  %v5329_v20 = vld [vmem:[%s9718_s4 + $0x5b0] sm:$0xff] }
 0x2c5   :  { %7849 = vmatpush3.bf16.msra.mxu1 %v7846_v58  ;;  %v4321_v58 = vld [vmem:[%s9718_s4 + $0x490] sm:$0xff] }
 0x2c6   :  { %7851 = vmatprep.subr.bf16.mxu1 %v7850_v19  ;;  %v7878_v60 = vpack.c.bf16 %v4322_v54, %v4321_v58  ;;  %v7918_v58 = vpack.c.bf16 %v4895_v13, %v4894_v45  ;;  %v4808_v54 = vadd.f32 %v9002_v35, %v9212_v4  ;;  %v5066_v4 = vld [vmem:[%s9718_s4 + $0x540] sm:$0xff]  ;;  %v4858_v13 = vadd.f32 %v9002_v35, %v9322_v56 }
 0x2c7   :  { %v5501_v56 = vld [vmem:[%s9718_s4 + $0x5e0] sm:$0xff] }
 0x2c8   :  { %7283 = vmatmul.mubr.msk.f32.vlgmr.msra.gmra.mrb[0].mxu1 %vm298_vm2, %v3956_v44  ;;  %v4409_v44 = vld [vmem:[%s9718_s4 + $0x4b8] sm:$0xff]  ;;  %v4878_v11 = vmax.f32 %v4808_v54, 0.0 }
 0x2c9   :  { %7853 = vmatpush3.bf16.msra.mxu1 %v7850_v19  ;;  %7293 = vmatprep.mubr.msk.f32.mxu1 %vm298_vm2, %v3957_v9  ;;  %v3927_v19 = vadd.f32 %v9002_v35, %v9150_v8  ;;  %v4408_v9 = vld [vmem:[%s9718_s4 + $0x4b0] sm:$0xff]  ;;  %v4493_v8 = vld [vmem:[%s9718_s4 + $0x4c0] sm:$0xff] }
 0x2ca   :  { %7855 = vmatprep.subr.bf16.mxu1 %v7854_v10  ;;  %v7886_v23 = vpack.c.bf16 %v4409_v44, %v4408_v9  ;;  %v4813_v9 = vadd.f32 %v9002_v35, %v9207_v63  ;;  %v5154_v63 = vld [vmem:[%s9718_s4 + $0x568] sm:$0xff] }
 0x2cd   :  { %7857 = vmatpush3.bf16.msra.mxu1 %v7854_v10  ;;  %v3965_v10 = vmax.f32 %v3927_v19, 0.0 }
 0x2ce   :  { %7859 = vmatprep.subr.bf16.mxu1 %v7858_v7 }
 0x2d0   :  { %7294 = vmatmul.mubr.msk.f32.vlgmr.msra.gmra.mrb[0].mxu1 %vm298_vm2, %v3958_v29  ;;  %v3966_v29 = vmax.f32 %v3932_v6, 0.0  ;;  %v4823_v6 = vadd.f32 %v9002_v35, %v9229_v18  ;;  %v5241_v18 = vld [vmem:[%s9718_s4 + $0x588] sm:$0xff] }
 0x2d1   :  { %7861 = vmatpush3.bf16.msra.mxu1 %v7858_v7  ;;  %7304 = vmatprep.mubr.msk.f32.mxu1 %vm298_vm2, %v3959_v41  ;;  %v7890_v7 = vpack.c.bf16 %v4494_v0, %v4493_v8  ;;  %v3967_v41 = vmax.f32 %v3937_v14, 0.0  ;;  %v4879_v8 = vmax.f32 %v4813_v9, 0.0  ;;  %v4828_v14 = vadd.f32 %v9002_v35, %v9256_v50  ;;  %v5240_v50 = vld [vmem:[%s9718_s4 + $0x580] sm:$0xff] }
 0x2d2   :  { %7863 = vmatprep.subr.bf16.mxu1 %v7862_v53  ;;  %v7946_v49 = vpack.c.bf16 %v5241_v18, %v5240_v50  ;;  %v5891_v18 = vld [vmem:[%s9724_s1] sm:$0xf] }
 0x2d5   :  { %7865 = vmatpush3.bf16.msra.mxu1 %v7862_v53  ;;  %v7894_v53 = vpack.c.bf16 %v4496_v17, %v4495_v40  ;;  %v5155_v40 = vld [vmem:[%s9718_s4 + $0x570] sm:$0xff]  ;;  %v5156_v17 = vld [vmem:[%s9718_s4 + $0x578] sm:$0xff] }
 0x2d6   :  { %7867 = vmatprep.subr.bf16.mxu1 %v7866_v36 }
 0x2d8   :  { %7305 = vmatmul.mubr.msk.f32.vlgmr.msra.gmra.mrb[0].mxu1 %vm298_vm2, %v3960_v42  ;;  %v4798_v42 = vadd.f32 %v9002_v35, %v9192_v52  ;;  %v4979_v52 = vld [vmem:[%s9718_s4 + $0x520] sm:$0xff] }
 0x2d9   :  { %7869 = vmatpush3.bf16.msra.mxu1 %v7866_v36  ;;  %7315 = vmatprep.mubr.msk.f32.mxu1 %vm298_vm2, %v3961_v33  ;;  %v4583_v36 = vld [vmem:[%s9718_s4 + $0x4f8] sm:$0xff] }
 0x2da   :  { %7871 = vmatprep.subr.bf16.mxu1 %v7870_v30  ;;  %v7902_v33 = vpack.c.bf16 %v4583_v36, %v4582_v32  ;;  %v4876_v37 = vmax.f32 %v4798_v42, 0.0  ;;  %v4884_v32 = vmax.f32 %v4838_v26, 0.0  ;;  %v4883_v36 = vmax.f32 %v4833_v16, 0.0  ;;  %v5330_v42 = vld [vmem:[%s9718_s4 + $0x5b8] sm:$0xff]  ;;  %v8096_v26 = vld [vmem:[%s9725_s10] sm:$0xff]   ;;  %v8097_v16 = vld [vmem:[%s9725_s10 + $0x8] sm:$0xff]  }
 0x2db   :  { %v7958_v45 = vpack.c.bf16 %v5330_v42, %v5329_v20 }
 0x2dd   :  { %7873 = vmatpush3.bf16.msra.mxu1 %v7870_v30  ;;  %v3952_v30 = vadd.f32 %v9002_v35, %v9174_v22  ;;  %v4980_v22 = vld [vmem:[%s9718_s4 + $0x528] sm:$0xff] }
 0x2de   :  { %7875 = vmatprep.subr.bf16.mxu1 %v7874_v51 }
 0x2e0   :  { %7316 = vmatmul.mubr.msk.f32.vlgmr.msra.gmra.mrb[0].mxu1 %vm298_vm2, %v3962_v34  ;;  %v7922_v34 = vpack.c.bf16 %v4980_v22, %v4979_v52  ;;  %v5417_v52 = vld [vmem:[%s9718_s4 + $0x5d8] sm:$0xff]  ;;  %v4888_v22 = vmax.f32 %v4858_v13, 0.0 }
 0x2e1   :  { %7877 = vmatpush3.bf16.msra.mxu1 %v7874_v51  ;;  %7326 = vmatprep.mubr.msk.f32.mxu1 %vm298_vm2, %v3963_v59  ;;  %v3970_v51 = vmax.f32 %v3952_v30, 0.0  ;;  %v4803_v59 = vadd.f32 %v9002_v35, %v9188_v46  ;;  %v5067_v46 = vld [vmem:[%s9718_s4 + $0x548] sm:$0xff] }
 0x2e2   :  { %7879 = vmatprep.subr.bf16.mxu1 %v7878_v60  ;;  %v7930_v44 = vpack.c.bf16 %v5067_v46, %v5066_v4 }
 0x2e3   :  { %v4877_v19 = vmax.f32 %v4803_v59, 0.0 }
 0x2e5   :  { %7881 = vmatpush3.bf16.msra.mxu1 %v7878_v60  ;;  %v4981_v60 = vld [vmem:[%s9718_s4 + $0x530] sm:$0xff] }
 0x2e6   :  { %7883 = vmatprep.subr.bf16.mxu1 %v7882_v48  ;;  %v7926_v57 = vpack.c.bf16 %v4982_v5, %v4981_v60 }
 0x2e8   :  { %7327 = vmatmul.mubr.msk.f32.vlgmr.msra.gmra.mrb[0].mxu1 %vm298_vm2, %v3964_v55  ;;  %v5069_v55 = vld [vmem:[%s9718_s4 + $0x558] sm:$0xff] }
 0x2e9   :  { %7885 = vmatpush3.bf16.msra.mxu1 %v7882_v48  ;;  %7337 = vmatprep.mubr.msk.f32.mxu1 %vm298_vm2, %v3965_v10  ;;  %v4818_v48 = vadd.f32 %v9002_v35, %v9234_v25  ;;  %v5068_v10 = vld [vmem:[%s9718_s4 + $0x550] sm:$0xff]  ;;  %v5153_v25 = vld [vmem:[%s9718_s4 + $0x560] sm:$0xff] }
 0x2ea   :  { %7887 = vmatprep.subr.bf16.mxu1 %v7886_v23  ;;  %v7934_v0 = vpack.c.bf16 %v5069_v55, %v5068_v10  ;;  %v8102_v10 = vmov 0.0  }
 0x2eb   :  { %7508 = vmatprep.subr.bf16.mxu0 %v8102_v10  ;;  %7512 = vmatprep.mubr.msk.bf16.mxu0 %vm8103_vm3, %v8102_v10 }
 0x2ed   :  { %7889 = vmatpush3.bf16.msra.mxu1 %v7886_v23  ;;  %v4880_v23 = vmax.f32 %v4818_v48, 0.0 }
 0x2ee   :  { %7891 = vmatprep.subr.bf16.mxu1 %v7890_v7 }
 0x2f0   :  { %7338 = vmatmul.mubr.msk.f32.vlgmr.msra.gmra.mrb[0].mxu1 %vm298_vm2, %v3966_v29  ;;  %v4881_v29 = vmax.f32 %v4823_v6, 0.0 }
 0x2f1   :  { %7893 = vmatpush3.bf16.msra.mxu1 %v7890_v7  ;;  %7348 = vmatprep.mubr.msk.f32.mxu1 %vm298_vm2, %v3967_v41  ;;  %v7938_v7 = vpack.c.bf16 %v5154_v63, %v5153_v25  ;;  %v4882_v41 = vmax.f32 %v4828_v14, 0.0 }
 0x2f2   :  { %7895 = vmatprep.subr.bf16.mxu1 %v7894_v53 }
 0x2f5   :  { %7897 = vmatpush3.bf16.msra.mxu1 %v7894_v53  ;;  %v7942_v53 = vpack.c.bf16 %v5156_v17, %v5155_v40  ;;  %v8094_v40 = vld [vmem:[%s9721_s6] sm:$0xff]  }
 0x2f6   :  { %7899 = vmatprep.subr.bf16.mxu1 %v7898_v31 }
 0x2f8   :  { %7349 = vmatmul.mubr.msk.f32.vlgmr.msra.gmra.mrb[0].mxu1 %vm298_vm2, %v3968_v39  ;;  %v4848_v39 = vadd.f32 %v9002_v35, %v9300_v24  ;;  %v5414_v24 = vld [vmem:[%s9718_s4 + $0x5c0] sm:$0xff] }
 0x2f9   :  { %7901 = vmatpush3.bf16.msra.mxu1 %v7898_v31  ;;  %7359 = vmatprep.mubr.msk.f32.mxu1 %vm298_vm2, %v3969_v38  ;;  %v5243_v31 = vld [vmem:[%s9718_s4 + $0x598] sm:$0xff] }
 0x2fa   :  { %7903 = vmatprep.subr.bf16.mxu1 %v7902_v33  ;;  %v7950_v38 = vpack.c.bf16 %v5243_v31, %v5242_v1  ;;  %v4886_v30 = vmax.f32 %v4848_v39, 0.0 }
 0x2fd   :  { %7905 = vmatpush3.bf16.msra.mxu1 %v7902_v33  ;;  %v4843_v33 = vadd.f32 %v9002_v35, %v9273_v2  ;;  %v5415_v2 = vld [vmem:[%s9718_s4 + $0x5c8] sm:$0xff] }
 0x2fe   :  { %7915 = vmatprep.subr.bf16.mxu1 %v7914_v62 }
 0x300   :  { %7360 = vmatmul.mubr.msk.f32.vlgmr.msra.gmra.mrb[0].mxu1 %vm298_vm2, %v3970_v51  ;;  %v7962_v51 = vpack.c.bf16 %v5415_v2, %v5414_v24  ;;  %v8098_v2 = vld [vmem:[%s9726_s12] sm:$0xff]  }
 0x301   :  { %7917 = vmatpush3.bf16.msra.mxu1 %v7914_v62  ;;  %7404 = vmatprep.mubr.msk.f32.mxu1 %vm298_vm2, %v4876_v37  ;;  %v4885_v62 = vmax.f32 %v4843_v33, 0.0  ;;  %v4853_v37 = vadd.f32 %v9002_v35, %v9295_v21  ;;  %v5502_v35 = vld [vmem:[%s9718_s4 + $0x5e8] sm:$0xff]  ;;  %v8101_v21 = vld [vmem:[%s9719_s3] ss:$0 sm:$0xff] }
 0x302   :  { %7919 = vmatprep.subr.bf16.mxu1 %v7918_v58  ;;  %v4863_v60 = vadd.f32 %v8101_v21, %v9317_v47  ;;  %v7970_v5 = vpack.c.bf16 %v5502_v35, %v5501_v56  ;;  %v4873_v47 = vadd.f32 %v8101_v21, %v9338_v61  ;;  %v8093_v61 = vld [vmem:[%s9720_s7 + $0x8] sm:$0xff]  }
 0x303   :  { %v4887_v54 = vmax.f32 %v4853_v37, 0.0  ;;  %v8099_v37 = vld [vmem:[%s9726_s12 + $0x8] sm:$0xff]  }
 0x304   :  { %v4889_v4 = vmax.f32 %v4863_v60, 0.0 }
 0x305   :  { %7921 = vmatpush3.bf16.msra.mxu1 %v7918_v58  ;;  %v5416_v58 = vld [vmem:[%s9718_s4 + $0x5d0] sm:$0xff] }
 0x306   :  { %7923 = vmatprep.subr.bf16.mxu1 %v7922_v34  ;;  %v7966_v59 = vpack.c.bf16 %v5417_v52, %v5416_v58 }
 0x308   :  { %7405 = vmatmul.mubr.msk.f32.vlgmr.msra.gmra.mrb[0].mxu1 %vm298_vm2, %v4877_v19  ;;  %v5504_v19 = vld [vmem:[%s9718_s4 + $0x5f8] sm:$0xff] }
 0x309   :  { %7925 = vmatpush3.bf16.msra.mxu1 %v7922_v34  ;;  %7415 = vmatprep.mubr.msk.f32.mxu1 %vm298_vm2, %v4878_v11  ;;  %v4868_v34 = vadd.f32 %v8101_v21, %v9340_v3  ;;  %v5503_v11 = vld [vmem:[%s9718_s4 + $0x5f0] sm:$0xff]  ;;  %v4891_v3 = vmax.f32 %v4873_v47, 0.0  ;;  %v6307_v21 = vld [vmem:[%s9729_s13] ss:$0 sm:$0xff] }
 0x30a   :  { %7927 = vmatprep.subr.bf16.mxu1 %v7926_v57  ;;  %v7974_v46 = vpack.c.bf16 %v5504_v19, %v5503_v11 }
 0x30d   :  { %7929 = vmatpush3.bf16.msra.mxu1 %v7926_v57  ;;  %v4890_v57 = vmax.f32 %v4868_v34, 0.0 }
 0x30e   :  { %7931 = vmatprep.subr.bf16.mxu1 %v7930_v44 }
 0x310   :  { %7416 = vmatmul.mubr.msk.f32.vlgmr.msra.gmra.mrb[0].mxu1 %vm298_vm2, %v4879_v8 }
 0x311   :  { %7933 = vmatpush3.bf16.msra.mxu1 %v7930_v44  ;;  %7426 = vmatprep.mubr.msk.f32.mxu1 %vm298_vm2, %v4880_v23  ;;  %v8092_v44 = vld [vmem:[%s9720_s7] sm:$0xff]  }
 0x312   :  { %7935 = vmatprep.subr.bf16.mxu1 %v7934_v0  ;;  %7509 = vmatpush3.bf16.msra.mxu0 %v8092_v44 }
 0x313   :  { %7510 = vmatprep.subr.bf16.mxu0 %v8102_v10 }
 0x315   :  { %7937 = vmatpush3.bf16.msra.mxu1 %v7934_v0  ;;  %v6294_v0 = vld [vmem:[%s9722_s5] ss:$0 sm:$0xff] }
 0x316   :  { %7939 = vmatprep.subr.bf16.mxu1 %v7938_v7  ;;  %7511 = vmatpush3.bf16.msra.mxu0 %v8093_v61 }
 0x317   :  { %7516 = vmatprep.subr.bf16.mxu0 %v8102_v10 }
 0x318   :  { %7427 = vmatmul.mubr.msk.f32.vlgmr.msra.gmra.mrb[0].mxu1 %vm298_vm2, %v4881_v29  ;;  %v5892_v29 = vld [vmem:[%s9723_s8] sm:$0xf] }
 0x319   :  { %7941 = vmatpush3.bf16.msra.mxu1 %v7938_v7  ;;  %7437 = vmatprep.mubr.msk.f32.mxu1 %vm298_vm2, %v4882_v41  ;;  %v5898_v50 = vsel %vm125_vm1, %v5892_v29, 0 }
 0x31a   :  { %7943 = vmatprep.subr.bf16.mxu1 %v7942_v53 }
 0x31d   :  { %7945 = vmatpush3.bf16.msra.mxu1 %v7942_v53 }
 0x31e   :  { %7947 = vmatprep.subr.bf16.mxu1 %v7946_v49 }
 0x320   :  { %7438 = vmatmul.mubr.msk.f32.vlgmr.msra.gmra.mrb[0].mxu1 %vm298_vm2, %v4883_v36 }
 0x321   :  { %7949 = vmatpush3.bf16.msra.mxu1 %v7946_v49  ;;  %7448 = vmatprep.mubr.msk.f32.mxu1 %vm298_vm2, %v4884_v32 }
 0x322   :  { %7951 = vmatprep.subr.bf16.mxu1 %v7950_v38 }
 0x325   :  { %7953 = vmatpush3.bf16.msra.mxu1 %v7950_v38 }
 0x326   :  { %7955 = vmatprep.subr.bf16.mxu1 %v7954_v15 }
 0x328   :  { %7449 = vmatmul.mubr.msk.f32.vlgmr.msra.gmra.mrb[0].mxu1 %vm298_vm2, %v4885_v62 }
 0x329   :  { %7957 = vmatpush3.bf16.msra.mxu1 %v7954_v15  ;;  %7459 = vmatprep.mubr.msk.f32.mxu1 %vm298_vm2, %v4886_v30  ;;  %v6302_v15 = vld [vmem:[%s9727_s9] ss:$0 sm:$0xff] }
 0x32a   :  { %7959 = vmatprep.subr.bf16.mxu1 %v7958_v45 }
 0x32d   :  { %7961 = vmatpush3.bf16.msra.mxu1 %v7958_v45 }
 0x32e   :  { %7963 = vmatprep.subr.bf16.mxu1 %v7962_v51 }
 0x330   :  { %7460 = vmatmul.mubr.msk.f32.vlgmr.msra.gmra.mrb[0].mxu1 %vm298_vm2, %v4887_v54 }
 0x331   :  { %7965 = vmatpush3.bf16.msra.mxu1 %v7962_v51  ;;  %7470 = vmatprep.mubr.msk.f32.mxu1 %vm298_vm2, %v4888_v22  ;;  %v6303_v51 = vld [vmem:[%s9728_s11] ss:$0 sm:$0xff] }
 0x332   :  { %7967 = vmatprep.subr.bf16.mxu1 %v7966_v59 }
 0x335   :  { %7969 = vmatpush3.bf16.msra.mxu1 %v7966_v59 }
 0x336   :  { %7971 = vmatprep.subr.bf16.mxu1 %v7970_v5 }
 0x338   :  { %7471 = vmatmul.mubr.msk.f32.vlgmr.msra.gmra.mrb[0].mxu1 %vm298_vm2, %v4889_v4 }
 0x339   :  { %7973 = vmatpush3.bf16.msra.mxu1 %v7970_v5  ;;  %7481 = vmatprep.mubr.msk.f32.mxu1 %vm298_vm2, %v4890_v57 }
 0x33a   :  { %7975 = vmatprep.subr.bf16.mxu1 %v7974_v46 }
 0x33d   :  { %7977 = vmatpush3.bf16.msra.mxu1 %v7974_v46 }
 0x340   :  { %7482 = vmatmul.mubr.msk.f32.vlgmr.msra.gmra.mrb[0].mxu1 %vm298_vm2, %v4891_v3 }
 0x38b   :  { %v7507_v48 = vpop.f32.mrb[100].mxu0 }
 0x38c   :  { %v5749_v9 = vpop.f32.mrb[101].mxu0 }
 0x413   :  { %v7483_v55 = vpop.f32.mrb[0].mxu1 }
 0x414   :  { %v7994_v23 = vadd.f32 %v7483_v55, %v8805_v27  ;;  %v5577_v8 = vpop.f32.mrb[1].mxu1  ;;  %v8095_v27 = vld [vmem:[%s9721_s6 + $0x8] sm:$0xff]  }
 0x415   :  { %v7996_v25 = vadd.f32 %v5577_v8, %v8807_v28 }
 0x416   :  { %v7995_v63 = vadd.f32 %v7994_v23, %v7507_v48 }
 0x417   :  { %v7997_v14 = vadd.f32 %v7996_v25, %v5749_v9 }
 0x418   :  { %v5768_v6 = vadd.f32 %v7995_v63, %v6294_v0 }
 0x419   :  { %v5767_v41 = vadd.f32 %v7997_v14, %v6294_v0 }
 0x41a   :  { %v5770_v7 = vmax.f32 %v5768_v6, 0.0 }
 0x41b   :  { %v5769_v28 = vmax.f32 %v5767_v41, 0.0 }
 0x41c   :  { %v5772_v17 = vpack.c.bf16 %v5770_v7, %v5770_v7 }
 0x41d   :  { %v5771_v53 = vpack.c.bf16 %v5769_v28, %v5769_v28 }
 0x41e   :  { %7513 = vmatmul.mubr.msk.bf16.vlgmr.msra.gmra.mrb[104].mxu0 %vm298_vm2, %v5772_v17 }
 0x41f   :  { %7517 = vmatpush3.bf16.msra.mxu0 %v8094_v40  ;;  %7520 = vmatprep.mubr.msk.bf16.mxu0 %vm8103_vm3, %v8102_v10 }
 0x420   :  { %7518 = vmatprep.subr.bf16.mxu0 %v8102_v10 }
 0x423   :  { %7519 = vmatpush3.bf16.msra.mxu0 %v8095_v27 }
 0x424   :  { %7524 = vmatprep.subr.bf16.mxu0 %v8102_v10 }
 0x426   :  { %7521 = vmatmul.mubr.msk.bf16.vlgmr.msra.gmra.mrb[108].mxu0 %vm298_vm2, %v5771_v53 }
 0x427   :  { %7525 = vmatpush3.bf16.msra.mxu0 %v5898_v50  ;;  %7526 = vmatprep.mubr.msk.bf16.mxu0 %vm8103_vm3, %v8102_v10 }
 0x428   :  { %7530 = vmatprep.subr.bf16.mxu0 %v8102_v10 }
 0x42e   :  { %7527 = vmatmul.mubr.msk.bf16.vlgmr.msra.gmra.mrb[112].mxu0 %vm5893_vm4, %v5891_v18 }
 0x42f   :  { %7534 = vmatprep.mubr.msk.bf16.mxu0 %vm8103_vm3, %v8102_v10  ;;  %7531 = vmatpush3.bf16.msra.mxu0 %v8096_v26 }
 0x430   :  { %7532 = vmatprep.subr.bf16.mxu0 %v8102_v10 }
 0x433   :  { %7533 = vmatpush3.bf16.msra.mxu0 %v8097_v16 }
 0x434   :  { %7538 = vmatprep.subr.bf16.mxu0 %v8102_v10 }
 0x4f1   :  { %v5830_v49 = vpop.f32.mrb[104].mxu0 }
 0x4f2   :  { %v7514_v1 = vpop.f32.mrb[105].mxu0 }
 0x4f3   :  { %v5833_v31 = vpop.f32.mrb[106].mxu0 }
 0x4f4   :  { %v7515_v32 = vpop.f32.mrb[107].mxu0 }
 0x4f9   :  { %v5885_v36 = vpop.f32.mrb[108].mxu0 }
 0x4fa   :  { %v5886_v38 = vadd.f32 %v5885_v36, %v5830_v49  ;;  %v7522_v12 = vpop.f32.mrb[109].mxu0 }
 0x4fb   :  { %v5888_v43 = vpop.f32.mrb[110].mxu0 }
 0x4fc   :  { %v7523_v39 = vpop.f32.mrb[111].mxu0 }
 0x501   :  { %v5934_v33 = vpop.f32.mrb[112].mxu0 }
 0x502   :  { %v5940_v20 = vadd.f32 %v5934_v33, %v5886_v38  ;;  %v7528_v42 = vpop.f32.mrb[113].mxu0 }
 0x503   :  { %v5937_v30 = vpop.f32.mrb[114].mxu0 }
 0x504   :  { %v5948_v62 = vadd.f32 %v6302_v15, %v5940_v20  ;;  %v7529_v45 = vpop.f32.mrb[115].mxu0 }
 0x506   :  { %v5949_v24 = vmax.f32 %v5948_v62, 0.0 }
 0x508   :  { %v5950_v13 = vpack.c.bf16 %v5949_v24, %v5949_v24 }
 0x50a   :  { %7535 = vmatmul.mubr.msk.bf16.vlgmr.msra.gmra.mrb[116].mxu0 %vm298_vm2, %v5950_v13 }
 0x50b   :  { %7539 = vmatpush3.bf16.msra.mxu0 %v8098_v2  ;;  %7542 = vmatprep.mubr.msk.bf16.mxu0 %vm8103_vm3, %v8102_v10 }
 0x50c   :  { %7540 = vmatprep.subr.bf16.mxu0 %v8102_v10 }
 0x50f   :  { %7541 = vmatpush3.bf16.msra.mxu0 %v8099_v37 }
 0x5dd   :  { %v6011_v58 = vpop.f32.mrb[116].mxu0 }
 0x5de   :  { %v6012_v52 = vadd.f32 %v6303_v51, %v6011_v58  ;;  %v7536_v22 = vpop.f32.mrb[117].mxu0 }
 0x5df   :  { %v6014_v54 = vpop.f32.mrb[118].mxu0 }
 0x5e0   :  { %v6017_v59 = vmax.f32 %v6012_v52, 0.0  ;;  %v7537_v56 = vpop.f32.mrb[119].mxu0 }
 0x5e2   :  { %v6018_v35 = vpack.c.bf16 %v6017_v59, %v6017_v59 }
 0x5e4   :  { %7543 = vmatmul.mubr.msk.bf16.vlgmr.msra.gmra.mrb[120].mxu0 %vm298_vm2, %v6018_v35 }
 0x6b7   :  { %v6079_v34 = vpop.f32.mrb[120].mxu0 }
 0x6b8   :  { %v6080_v60 = vadd.f32 %v6307_v21, %v6079_v34  ;;  %v7544_v5 = vpop.f32.mrb[121].mxu0 }
 0x6b9   :  { %v6082_v11 = vpop.f32.mrb[122].mxu0 }
 0x6ba   :  { %6085 = vst [vmem:[%s9730_s14] sm:$0xff] %v6080_v60  ;;  %v7545_v19 = vpop.f32.mrb[123].mxu0 }

</bundles_post_ra>
